<compile_context>
chip_gen: v7x
topology: tpu7x:2x2x1
jax: 0.10.0
libtpu: 0.0.40
codegen_flags: <defaults>
</compile_context>

<pallas_src>
import numpy as np
import jax
import jax.numpy as jnp
from jax.experimental import pallas as pl
from jax.experimental.pallas import tpu as pltpu

WINDOW = 5
SIGMA = 1.5
PAD = WINDOW // 2
MAX_VAL = 1.0
C1 = (0.01 * MAX_VAL) ** 2
C2 = (0.03 * MAX_VAL) ** 2

_LANE_TARGET = 128      # pack images along lanes until >= 128 lanes
_SUBLANE_TARGET = 128   # pack images along sublanes until >= 128 sublanes


def _cdiv(a, b):
    return -(-a // b)


def _gaussian_1d(window_size: int, sigma: float) -> np.ndarray:
    # Matches kornia.filters.kernels.gaussian (deterministic constant).
    x = np.arange(window_size, dtype=np.float64) - window_size // 2
    if window_size % 2 == 0:
        x = x + 0.5
    g = np.exp(-(x ** 2) / (2.0 * sigma ** 2))
    return (g / g.sum()).astype(np.float32)


def _conv_matrix(n: int, g: np.ndarray) -> np.ndarray:
    """(n, n) matrix M s.t. X @ M applies the reflect-padded 1-D Gaussian conv along
    the last axis of X (kornia filter2d border_type='reflect', mirror excluding edge).
    The row conv is M(h).T @ X."""
    assert n > PAD, "reflect padding needs dim > pad"
    m = np.zeros((n, n), dtype=np.float64)
    for j in range(n):
        for k in range(WINDOW):
            p = j + k - PAD
            if p < 0:
                p = -p
            elif p >= n:
                p = 2 * (n - 1) - p
            m[p, j] += g[k]
    return m.astype(np.float32)


def _ssim_block_kernel(x_ref, y_ref, cw_ref, rh_ref, out_ref):
    """One grid step = one (S*h, G*w) slab holding S*G image planes.
    Writes lane-dense per-block partial loss sums of shape (1, G*w)."""
    xb = x_ref[0].astype(jnp.float32)      # (SH, GW)
    yb = y_ref[0].astype(jnp.float32)
    cw = cw_ref[...]                        # (GW, GW) block-diag column-conv matrix
    rh = rh_ref[...]                        # (SH, SH) block-diag row-conv matrix

    def conv(z):
        # Separable 5x5 Gaussian conv + reflect border, entirely on the MXU.
        t = jnp.dot(z, cw, preferred_element_type=jnp.float32,
                    precision=jax.lax.Precision.HIGHEST)
        return jnp.dot(rh, t, preferred_element_type=jnp.float32,
                       precision=jax.lax.Precision.HIGHEST)

    mu1 = conv(xb)
    mu2 = conv(yb)
    mu1_sq = mu1 * mu1
    mu2_sq = mu2 * mu2
    mu12 = mu1 * mu2
    # sigma terms formed immediately after each conv to limit live temporaries
    s1 = conv(xb * xb) - mu1_sq
    s2 = conv(yb * yb) - mu2_sq
    s12 = conv(xb * yb) - mu12

    num = (2.0 * mu12 + C1) * (2.0 * s12 + C2)
    den = (mu1_sq + mu2_sq + C1) * (s1 + s2 + C2)
    loss_map = jnp.clip((1.0 - num / den) * 0.5, 0.0, 1.0)

    # Only a sublane reduction in-kernel; lane-dense (1, GW) partial-sum store.
    out_ref[0] = jnp.sum(loss_map, axis=0, keepdims=True)


def sequence_ssim_loss(x, y):
    """x, y: (b_len, n, c, h, w) images in [0, 1]. Returns scalar SSIM loss (mean)."""
    assert x.shape == y.shape
    b_len, n, c, h, w = x.shape
    B = b_len * n * c
    xf = jnp.reshape(x, (B, h, w))          # keep original dtype through the DMA
    yf = jnp.reshape(y, (B, h, w))

    # Packing factors: G planes side-by-side along lanes, S stacked along sublanes.
    # Larger packing would linearly inflate the block-diagonal MXU work per pixel,
    # so 128/128 targets are the sweet spot between step overhead and MXU flops.
    G = max(1, _cdiv(_LANE_TARGET, w)) if w < _LANE_TARGET else 1
    s_cap = max(1, _cdiv(_SUBLANE_TARGET, h)) if h < _SUBLANE_TARGET else 1
    S = max(1, min(s_cap, _cdiv(B, G)))
    per_block = S * G
    NB = _cdiv(B, per_block)
    B_pad = NB * per_block
    SH, GW = S * h, G * w

    if B_pad != B:   # zero planes contribute exactly 0 loss (no eps in denominator)
        xf = jnp.concatenate([xf, jnp.zeros((B_pad - B, h, w), xf.dtype)], axis=0)
        yf = jnp.concatenate([yf, jnp.zeros((B_pad - B, h, w), yf.dtype)], axis=0)

    def pack(a):
        if G == 1:
            # Pure reshape: no host-side transpose copy for wide planes.
            return a.reshape(NB, SH, GW)
        # (B_pad, h, w) -> (NB, S, G, h, w) -> (NB, S, h, G, w) -> (NB, S*h, G*w)
        a = a.reshape(NB, S, G, h, w)
        a = jnp.transpose(a, (0, 1, 3, 2, 4))
        return a.reshape(NB, SH, GW)

    xt, yt = pack(xf), pack(yf)

    g = _gaussian_1d(WINDOW, SIGMA)
    cw_bd = jnp.asarray(np.kron(np.eye(G, dtype=np.float32), _conv_matrix(w, g)))
    rh_bd = jnp.asarray(np.kron(np.eye(S, dtype=np.float32), _conv_matrix(h, g).T))

    partial = pl.pallas_call(
        _ssim_block_kernel,
        out_shape=jax.ShapeDtypeStruct((NB, 1, GW), jnp.float32),
        grid_spec=pltpu.PrefetchScalarGridSpec(
            num_scalar_prefetch=0,
            grid=(NB,),
            in_specs=[
                pl.BlockSpec((1, SH, GW), lambda i: (i, 0, 0)),
                pl.BlockSpec((1, SH, GW), lambda i: (i, 0, 0)),
                pl.BlockSpec((GW, GW), lambda i: (0, 0)),   # resident, not re-DMA'd
                pl.BlockSpec((SH, SH), lambda i: (0, 0)),   # resident, not re-DMA'd
            ],
            out_specs=pl.BlockSpec((1, 1, GW), lambda i: (i, 0, 0)),
        ),
        compiler_params=pltpu.CompilerParams(
            dimension_semantics=("parallel",),   # independent blocks -> both TCs on v7x
        ),
    )(xt, yt, cw_bd, rh_bd)

    return jnp.sum(partial) / jnp.float32(B * h * w)


def _reference_ssim_loss(x, y):
    """Pure-JAX tap-based reference (independent of the matmul formulation)."""
    b_len, n, c, h, w = x.shape
    B = b_len * n * c
    xf = jnp.reshape(x, (B, h, w)).astype(jnp.float32)
    yf = jnp.reshape(y, (B, h, w)).astype(jnp.float32)
    xp = jnp.pad(xf, ((0, 0), (PAD, PAD), (PAD, PAD)), mode="reflect")
    yp = jnp.pad(yf, ((0, 0), (PAD, PAD), (PAD, PAD)), mode="reflect")
    g = jnp.asarray(_gaussian_1d(WINDOW, SIGMA))

    def conv(img):
        r = sum(g[dx] * img[:, :, dx:dx + w] for dx in range(WINDOW))
        return sum(g[dy] * r[:, dy:dy + h, :] for dy in range(WINDOW))

    mu1, mu2 = conv(xp), conv(yp)
    s1 = conv(xp * xp) - mu1 * mu1
    s2 = conv(yp * yp) - mu2 * mu2
    s12 = conv(xp * yp) - mu1 * mu2
    num = (2.0 * mu1 * mu2 + C1) * (2.0 * s12 + C2)
    den = (mu1 * mu1 + mu2 * mu2 + C1) * (s1 + s2 + C2)
    ssim_map = num / den
    return jnp.mean(jnp.clip((1.0 - ssim_map) * 0.5, 0.0, 1.0))


if __name__ == "__main__":
    key = jax.random.PRNGKey(0)

    # Case 1: module-shaped small input (B=12 planes of 16x16; exercises zero-pad path).
    k1, k2, k3, k4 = jax.random.split(key, 4)
    x1 = jax.random.uniform(k1, (2, 2, 3, 16, 16), dtype=jnp.float32)
    y1 = jax.random.uniform(k2, (2, 2, 3, 16, 16), dtype=jnp.float32)
    loss1 = jax.block_until_ready(sequence_ssim_loss(x1, y1))
    ref1 = jax.block_until_ready(_reference_ssim_loss(x1, y1))
    assert jnp.allclose(loss1, ref1, atol=1e-4, rtol=1e-4), (loss1, ref1)

    # Case 2: larger planes, multi-block grid (NB > 1) with the parallel grid axis.
    x2 = jax.random.uniform(k3, (2, 5, 1, 48, 48), dtype=jnp.float32)
    y2 = jax.random.uniform(k4, (2, 5, 1, 48, 48), dtype=jnp.float32)
    loss2 = jax.block_until_ready(sequence_ssim_loss(x2, y2))
    ref2 = jax.block_until_ready(_reference_ssim_loss(x2, y2))
    assert jnp.allclose(loss2, ref2, atol=1e-4, rtol=1e-4), (loss2, ref2)

    print("KERNEL_OK")
</pallas_src>

<mosaic_0001>
module attributes {stable_mosaic.version = 11 : i64} {
  func.func @_ssim_block_kernel(%arg0: i32, %arg1: memref<1x32x128xf32, #tpu.memory_space<vmem>>, %arg2: memref<1x32x128xf32, #tpu.memory_space<vmem>>, %arg3: memref<128x128xf32, #tpu.memory_space<vmem>>, %arg4: memref<32x32xf32, #tpu.memory_space<vmem>>, %arg5: memref<1x1x128xf32, #tpu.memory_space<vmem>>) attributes {dimension_semantics = [#tpu.dimension_semantics<parallel>], iteration_bounds = array<i64: 1>, scalar_prefetch = 0 : i64, scratch_operands = 0 : i64, tpu.core_type = #tpu.core_type<tc>, window_params = [{transform_indices = @transform_0, window_bounds = array<i64: 1, 32, 128>}, {transform_indices = @transform_1, window_bounds = array<i64: 1, 32, 128>}, {pipeline_mode = #tpu.pipeline_mode<synchronous>, transform_indices = @transform_2, window_bounds = array<i64: 128, 128>}, {pipeline_mode = #tpu.pipeline_mode<synchronous>, transform_indices = @transform_3, window_bounds = array<i64: 32, 32>}, {transform_indices = @transform_4, window_bounds = array<i64: 1, 1, 128>}]} {
    %c0 = arith.constant 0 : index
    %c0_0 = arith.constant 0 : index
    %c0_1 = arith.constant 0 : index
    %0 = vector.load %arg1[%c0, %c0_0, %c0_1] : memref<1x32x128xf32, #tpu.memory_space<vmem>>, vector<1x32x128xf32>
    %1 = vector.shape_cast %0 : vector<1x32x128xf32> to vector<32x128xf32>
    %c0_2 = arith.constant 0 : index
    %c0_3 = arith.constant 0 : index
    %c0_4 = arith.constant 0 : index
    %2 = vector.load %arg2[%c0_2, %c0_3, %c0_4] : memref<1x32x128xf32, #tpu.memory_space<vmem>>, vector<1x32x128xf32>
    %3 = vector.shape_cast %2 : vector<1x32x128xf32> to vector<32x128xf32>
    %c0_5 = arith.constant 0 : index
    %c0_6 = arith.constant 0 : index
    %4 = vector.load %arg3[%c0_5, %c0_6] : memref<128x128xf32, #tpu.memory_space<vmem>>, vector<128x128xf32>
    %c0_7 = arith.constant 0 : index
    %c0_8 = arith.constant 0 : index
    %5 = vector.load %arg4[%c0_7, %c0_8] : memref<32x32xf32, #tpu.memory_space<vmem>>, vector<32x32xf32>
    %cst = arith.constant dense<0.000000e+00> : vector<32x128xf32>
    %6 = tpu.matmul %1, %4, %cst {dimension_numbers = #tpu.dot_dimension_numbers<[1], [0], [0], [1], [0, 0, 1, 1], [], []>, precision = #tpu.contract_precision<fp32>} : vector<32x128xf32>, vector<128x128xf32>, vector<32x128xf32> -> vector<32x128xf32>
    %cst_9 = arith.constant dense<0.000000e+00> : vector<32x128xf32>
    %7 = tpu.matmul %5, %6, %cst_9 {dimension_numbers = #tpu.dot_dimension_numbers<[1], [0], [0], [1], [0, 0, 1, 1], [], []>, precision = #tpu.contract_precision<fp32>} : vector<32x32xf32>, vector<32x128xf32>, vector<32x128xf32> -> vector<32x128xf32>
    %cst_10 = arith.constant dense<0.000000e+00> : vector<32x128xf32>
    %8 = tpu.matmul %3, %4, %cst_10 {dimension_numbers = #tpu.dot_dimension_numbers<[1], [0], [0], [1], [0, 0, 1, 1], [], []>, precision = #tpu.contract_precision<fp32>} : vector<32x128xf32>, vector<128x128xf32>, vector<32x128xf32> -> vector<32x128xf32>
    %cst_11 = arith.constant dense<0.000000e+00> : vector<32x128xf32>
    %9 = tpu.matmul %5, %8, %cst_11 {dimension_numbers = #tpu.dot_dimension_numbers<[1], [0], [0], [1], [0, 0, 1, 1], [], []>, precision = #tpu.contract_precision<fp32>} : vector<32x32xf32>, vector<32x128xf32>, vector<32x128xf32> -> vector<32x128xf32>
    %10 = arith.mulf %7, %7 : vector<32x128xf32>
    %11 = arith.mulf %9, %9 : vector<32x128xf32>
    %12 = arith.mulf %7, %9 : vector<32x128xf32>
    %13 = arith.mulf %1, %1 : vector<32x128xf32>
    %cst_12 = arith.constant dense<0.000000e+00> : vector<32x128xf32>
    %14 = tpu.matmul %13, %4, %cst_12 {dimension_numbers = #tpu.dot_dimension_numbers<[1], [0], [0], [1], [0, 0, 1, 1], [], []>, precision = #tpu.contract_precision<fp32>} : vector<32x128xf32>, vector<128x128xf32>, vector<32x128xf32> -> vector<32x128xf32>
    %cst_13 = arith.constant dense<0.000000e+00> : vector<32x128xf32>
    %15 = tpu.matmul %5, %14, %cst_13 {dimension_numbers = #tpu.dot_dimension_numbers<[1], [0], [0], [1], [0, 0, 1, 1], [], []>, precision = #tpu.contract_precision<fp32>} : vector<32x32xf32>, vector<32x128xf32>, vector<32x128xf32> -> vector<32x128xf32>
    %16 = arith.subf %15, %10 : vector<32x128xf32>
    %17 = arith.mulf %3, %3 : vector<32x128xf32>
    %cst_14 = arith.constant dense<0.000000e+00> : vector<32x128xf32>
    %18 = tpu.matmul %17, %4, %cst_14 {dimension_numbers = #tpu.dot_dimension_numbers<[1], [0], [0], [1], [0, 0, 1, 1], [], []>, precision = #tpu.contract_precision<fp32>} : vector<32x128xf32>, vector<128x128xf32>, vector<32x128xf32> -> vector<32x128xf32>
    %cst_15 = arith.constant dense<0.000000e+00> : vector<32x128xf32>
    %19 = tpu.matmul %5, %18, %cst_15 {dimension_numbers = #tpu.dot_dimension_numbers<[1], [0], [0], [1], [0, 0, 1, 1], [], []>, precision = #tpu.contract_precision<fp32>} : vector<32x32xf32>, vector<32x128xf32>, vector<32x128xf32> -> vector<32x128xf32>
    %20 = arith.subf %19, %11 : vector<32x128xf32>
    %21 = arith.mulf %1, %3 : vector<32x128xf32>
    %cst_16 = arith.constant dense<0.000000e+00> : vector<32x128xf32>
    %22 = tpu.matmul %21, %4, %cst_16 {dimension_numbers = #tpu.dot_dimension_numbers<[1], [0], [0], [1], [0, 0, 1, 1], [], []>, precision = #tpu.contract_precision<fp32>} : vector<32x128xf32>, vector<128x128xf32>, vector<32x128xf32> -> vector<32x128xf32>
    %cst_17 = arith.constant dense<0.000000e+00> : vector<32x128xf32>
    %23 = tpu.matmul %5, %22, %cst_17 {dimension_numbers = #tpu.dot_dimension_numbers<[1], [0], [0], [1], [0, 0, 1, 1], [], []>, precision = #tpu.contract_precision<fp32>} : vector<32x32xf32>, vector<32x128xf32>, vector<32x128xf32> -> vector<32x128xf32>
    %24 = arith.subf %23, %12 : vector<32x128xf32>
    %cst_18 = arith.constant 2.000000e+00 : f32
    %25 = vector.broadcast %cst_18 : f32 to vector<32x128xf32>
    %26 = arith.mulf %25, %12 : vector<32x128xf32>
    %cst_19 = arith.constant 9.99999974E-5 : f32
    %27 = vector.broadcast %cst_19 : f32 to vector<32x128xf32>
    %28 = arith.addf %26, %27 : vector<32x128xf32>
    %cst_20 = arith.constant 2.000000e+00 : f32
    %29 = vector.broadcast %cst_20 : f32 to vector<32x128xf32>
    %30 = arith.mulf %29, %24 : vector<32x128xf32>
    %cst_21 = arith.constant 8.99999984E-4 : f32
    %31 = vector.broadcast %cst_21 : f32 to vector<32x128xf32>
    %32 = arith.addf %30, %31 : vector<32x128xf32>
    %33 = arith.mulf %28, %32 : vector<32x128xf32>
    %34 = arith.addf %10, %11 : vector<32x128xf32>
    %cst_22 = arith.constant 9.99999974E-5 : f32
    %35 = vector.broadcast %cst_22 : f32 to vector<32x128xf32>
    %36 = arith.addf %34, %35 : vector<32x128xf32>
    %37 = arith.addf %16, %20 : vector<32x128xf32>
    %cst_23 = arith.constant 8.99999984E-4 : f32
    %38 = vector.broadcast %cst_23 : f32 to vector<32x128xf32>
    %39 = arith.addf %37, %38 : vector<32x128xf32>
    %40 = arith.mulf %36, %39 : vector<32x128xf32>
    %41 = arith.divf %33, %40 : vector<32x128xf32>
    %cst_24 = arith.constant 1.000000e+00 : f32
    %42 = vector.broadcast %cst_24 : f32 to vector<32x128xf32>
    %43 = arith.subf %42, %41 : vector<32x128xf32>
    %cst_25 = arith.constant 5.000000e-01 : f32
    %44 = vector.broadcast %cst_25 : f32 to vector<32x128xf32>
    %45 = arith.mulf %43, %44 : vector<32x128xf32>
    %cst_26 = arith.constant 0.000000e+00 : f32
    %cst_27 = arith.constant 1.000000e+00 : f32
    %46 = vector.broadcast %cst_26 : f32 to vector<32x128xf32>
    %47 = arith.maximumf %46, %45 : vector<32x128xf32>
    %48 = vector.broadcast %cst_27 : f32 to vector<32x128xf32>
    %49 = arith.minimumf %48, %47 : vector<32x128xf32>
    %cst_28 = arith.constant dense<0.000000e+00> : vector<128xf32>
    %50 = vector.multi_reduction <add>, %49, %cst_28 [0] : vector<32x128xf32> to vector<128xf32>
    %51 = vector.shape_cast %50 : vector<128xf32> to vector<1x128xf32>
    %c0_29 = arith.constant 0 : index
    %c0_30 = arith.constant 0 : index
    %c0_31 = arith.constant 0 : index
    %52 = vector.load %arg5[%c0_29, %c0_30, %c0_31] : memref<1x1x128xf32, #tpu.memory_space<vmem>>, vector<1x1x128xf32>
    %53 = vector.shape_cast %52 : vector<1x1x128xf32> to vector<1x128xf32>
    %54 = vector.shape_cast %51 : vector<1x128xf32> to vector<1x1x128xf32>
    tpu.vector_store %arg5[%c0_29, %c0_30, %c0_31], %54 {strides = array<i32>} : memref<1x1x128xf32, #tpu.memory_space<vmem>>, vector<1x1x128xf32>,
    return
  }
  func.func @transform_0(%arg0: i32) -> (i32, i32, i32) {
    %c0_i32 = arith.constant 0 : i32
    %c0_i32_0 = arith.constant 0 : i32
    %c0_i32_1 = arith.constant 0 : i32
    return %arg0, %c0_i32, %c0_i32_0 : i32, i32, i32
  }
  func.func @transform_1(%arg0: i32) -> (i32, i32, i32) {
    %c0_i32 = arith.constant 0 : i32
    %c0_i32_0 = arith.constant 0 : i32
    %c0_i32_1 = arith.constant 0 : i32
    return %arg0, %c0_i32, %c0_i32_0 : i32, i32, i32
  }
  func.func @transform_2(%arg0: i32) -> (i32, i32) {
    %c0_i32 = arith.constant 0 : i32
    %c0_i32_0 = arith.constant 0 : i32
    %c0_i32_1 = arith.constant 0 : i32
    return %c0_i32, %c0_i32_0 : i32, i32
  }
  func.func @transform_3(%arg0: i32) -> (i32, i32) {
    %c0_i32 = arith.constant 0 : i32
    %c0_i32_0 = arith.constant 0 : i32
    %c0_i32_1 = arith.constant 0 : i32
    return %c0_i32, %c0_i32_0 : i32, i32
  }
  func.func @transform_4(%arg0: i32) -> (i32, i32, i32) {
    %c0_i32 = arith.constant 0 : i32
    %c0_i32_0 = arith.constant 0 : i32
    %c0_i32_1 = arith.constant 0 : i32
    return %arg0, %c0_i32, %c0_i32_0 : i32, i32, i32
  }
}

</mosaic_0001>

<bundles_post_ra>
// kernel: tpu_custom_call.1
= control target key start
LH: loop header
LB: loop body
LE: loop exit
PB: predicated region body
PF: predicated region fallthrough
CT: control target
= control target key end

     0   :  { %9 = vsyncpa [#allocation3], 0  ;;  %s12580_s0 = inlined_call_operand.hbm [shape: f32[1,32,128], index: 0, kind: input, shape index: {}]   ;;  %s12581_s1 = inlined_call_operand.hbm [shape: f32[1,32,128], index: 1, kind: input, shape index: {}]   ;;  %s12582_s2 = inlined_call_operand.hbm [shape: f32[128,128], index: 2, kind: input, shape index: {}]   ;;  %s12583_s3 = inlined_call_operand.hbm [shape: f32[32,32], index: 3, kind: input, shape index: {}]   ;;  %s12584_s4 = inlined_call_operand.hbm [shape: f32[1,1,128], index: 4, kind: output, shape index: {}]  }
   0x1   :  { %10 = vsyncpa [#allocation6], 0 }
   0x2   :  { %11 = vsyncpa [#allocation9], 0 }
   0x3   :  { %12 = vsyncpa [#allocation4], 0  ;;  %s11102_s15 = smov [#allocation5]   ;;  %s11103_s17 = smov [#allocation2]  }
   0x4   :  { %s30_s16 = sshll.u32 %s11102_s15, 4  ;;  %s18_s18 = sshll.u32 %s11103_s17, 4  ;;  %s31_s16 = int_to_ptr.vmem [resolvable:$true] %s30_s16  ;;  %s11134_s18 = int_to_ptr.vmem [resolvable:$true] %s18_s18 }
   0x5   :  { %s10984_s21 = scalar_lea.hbm %s12581_s1, 512 }
   0x6   :  { %p10985_p0 = scmp.ne.s32.totalorder %s12581_s1, %s10984_s21  ;;  %p10988_p1 = scmp.lt.u32.totalorder %s10984_s21, %s12581_s1 }
   0x8   :  { %p10990_p2 = pnand %p10988_p1, %p10985_p0 }
   0xa   :  { %10993 = shalt.err (!%p10990_p2)
}
   0xb   :  { %s10994_s26 = scalar_lea.vmem %s31_s16, 512  ;;  %p10999_p4 = scmp.lt.s32.totalorder %s31_s16, %s31_s16 }
   0xc   :  { %p10995_p3 = scmp.ne.s32.totalorder %s31_s16, %s10994_s26  ;;  %p11000_p5 = scmp.lt.s32.totalorder %s10994_s26, %s10994_s26 }
   0xe   :  { %p11001_p6 = por %p11000_p5, %p10999_p4 }
  0x10   :  { %p11002_p7 = pnand %p11001_p6, %p10995_p3 }
  0x12   :  { %11005 = shalt.err (!%p11002_p7)
}
  0x13   :  { %s11104_s27 = smov 128   ;;  %s11105_s28 = smov 8  }
  0x14   :  { %36 = dma.hbm_to_vmem [thread:$0]  %s12581_s1, 512, %s31_s16, [#allocation6], %s11104_s27, %s11104_s27, %s11105_s28  }
  0x15   :  { %s11006_s7 = scalar_lea.hbm %s12580_s0, 512 }
  0x16   :  { %p11007_p8 = scmp.ne.s32.totalorder %s12580_s0, %s11006_s7  ;;  %p11010_p9 = scmp.lt.u32.totalorder %s11006_s7, %s12580_s0 }
  0x18   :  { %p11012_p10 = pnand %p11010_p9, %p11007_p8 }
  0x1a   :  { %11015 = shalt.err (!%p11012_p10)
}
  0x1b   :  { %s11016_s12 = scalar_lea.vmem %s11134_s18, 512  ;;  %p11021_p12 = scmp.lt.s32.totalorder %s11134_s18, %s11134_s18 }
  0x1c   :  { %p11017_p11 = scmp.ne.s32.totalorder %s11134_s18, %s11016_s12  ;;  %p11022_p13 = scmp.lt.s32.totalorder %s11016_s12, %s11016_s12 }
  0x1e   :  { %p11023_p0 = por %p11022_p13, %p11021_p12 }
  0x20   :  { %p11024_p1 = pnand %p11023_p0, %p11017_p11 }
  0x22   :  { %11027 = shalt.err (!%p11024_p1)
}
  0x23   :  { %24 = dma.hbm_to_vmem [thread:$0]  %s12580_s0, 512, %s11134_s18, [#allocation3], %s11104_s27, %s11104_s27, %s11105_s28  }
  0x24   :  { %s11106_s14 = smov [#allocation7]   ;;  %s11107_s16 = smov [#allocation8]  }
  0x25   :  { %s42_s15 = sshll.u32 %s11106_s14, 4  ;;  %s54_s17 = sshll.u32 %s11107_s16, 4  ;;  %s43_s15 = int_to_ptr.vmem [resolvable:$true] %s42_s15  ;;  %s11171_s17 = int_to_ptr.vmem [resolvable:$true] %s54_s17 }
  0x26   :  { %s11028_s21 = scalar_lea.hbm %s12582_s2, 2048 }
  0x27   :  { %p11029_p2 = scmp.ne.s32.totalorder %s12582_s2, %s11028_s21  ;;  %p11032_p3 = scmp.lt.u32.totalorder %s11028_s21, %s12582_s2 }
  0x29   :  { %p11034_p4 = pnand %p11032_p3, %p11029_p2 }
  0x2b   :  { %11037 = shalt.err (!%p11034_p4)
}
  0x2c   :  { %s11038_s0 = scalar_lea.vmem %s43_s15, 2048  ;;  %p11043_p6 = scmp.lt.s32.totalorder %s43_s15, %s43_s15 }
  0x2d   :  { %p11039_p5 = scmp.ne.s32.totalorder %s43_s15, %s11038_s0  ;;  %p11044_p7 = scmp.lt.s32.totalorder %s11038_s0, %s11038_s0 }
  0x2f   :  { %p11045_p8 = por %p11044_p7, %p11043_p6 }
  0x31   :  { %p11046_p9 = pnand %p11045_p8, %p11039_p5 }
  0x33   :  { %11049 = shalt.err (!%p11046_p9)
}
  0x34   :  { %48 = dma.hbm_to_vmem [thread:$0]  %s12582_s2, 2048, %s43_s15, [#allocation6], %s11104_s27, %s11104_s27, %s11105_s28  }
  0x35   :  { %s11050_s5 = scalar_lea.hbm %s12583_s3, 512 }
  0x36   :  { %p11051_p10 = scmp.ne.s32.totalorder %s12583_s3, %s11050_s5  ;;  %p11054_p11 = scmp.lt.u32.totalorder %s11050_s5, %s12583_s3 }
  0x38   :  { %p11056_p12 = pnand %p11054_p11, %p11051_p10 }
  0x3a   :  { %11059 = shalt.err (!%p11056_p12)
}
  0x3b   :  { %s11060_s10 = scalar_lea.vmem %s11171_s17, 512  ;;  %p11065_p0 = scmp.lt.s32.totalorder %s11171_s17, %s11171_s17 }
  0x3c   :  { %p11061_p13 = scmp.ne.s32.totalorder %s11171_s17, %s11060_s10  ;;  %p11066_p1 = scmp.lt.s32.totalorder %s11060_s10, %s11060_s10 }
  0x3e   :  { %p11067_p2 = por %p11066_p1, %p11065_p0 }
  0x40   :  { %p11068_p3 = pnand %p11067_p2, %p11061_p13 }
  0x42   :  { %11071 = shalt.err (!%p11068_p3)
}
  0x43   :  { %60 = dma.hbm_to_vmem [thread:$0]  %s12583_s3, 512, %s11171_s17, [#allocation9], %s11104_s27, %s11104_s27, %s11105_s28  }
  0x44   :  { %11094 = dma.done.wait [#allocation3], 512  }
  0x45   :  { %11095 = vsyncadd [#allocation3], 4294966784 }
  0x46   :  { %11096 = dma.done.wait [#allocation6], 2560  }
  0x47   :  { %11097 = vsyncadd [#allocation6], 4294964736 }
  0x48   :  { %11098 = dma.done.wait [#allocation9], 512  }
  0x49   :  { %11099 = vsyncadd [#allocation9], 4294966784  ;;  %v81_v0 = vld [vmem:[#allocation7] sm:$0xff]  ;;  %v82_v1 = vld [vmem:[#allocation7 + $0x8] sm:$0xff]  ;;  %vm871_vm0 = vcmask 261120   ;;  %s11108_s3 = smov [#allocation10]  }
  0x4a   :  { %v83_v2 = vld [vmem:[#allocation7 + $0x10] sm:$0xff]  ;;  %v102_v3 = vand.u32 4294901760, %v81_v0  ;;  %v105_v4 = vand.u32 4294901760, %v82_v1  ;;  %v84_v5 = vld [vmem:[#allocation7 + $0x18] sm:$0xff]  ;;  %v85_v7 = vld [vmem:[#allocation7 + $0x20] sm:$0xff]  ;;  %s7150_s27 = sshll.u32 %s11108_s3, 4  ;;  %s7151_s27 = int_to_ptr.vmem [resolvable:$true] %s7150_s27 }
  0x4b   :  { %v108_v6 = vand.u32 4294901760, %v83_v2  ;;  %v86_v8 = vld [vmem:[#allocation7 + $0x28] sm:$0xff]  ;;  %v111_v9 = vand.u32 4294901760, %v84_v5  ;;  %v114_v10 = vand.u32 4294901760, %v85_v7  ;;  %v87_v12 = vld [vmem:[#allocation7 + $0x30] sm:$0xff]  ;;  %v88_v13 = vld [vmem:[#allocation7 + $0x38] sm:$0xff]  ;;  %p11077_p5 = scmp.lt.s32.totalorder %s7151_s27, %s7151_s27 }
  0x4c   :  { %v117_v11 = vand.u32 4294901760, %v86_v8  ;;  %v11208_v14 = vpack.c.bf16 %v105_v4, %v102_v3  ;;  %v11210_v15 = vsub.f32 %v81_v0, %v102_v3  ;;  %v11212_v16 = vsub.f32 %v82_v1, %v105_v4  ;;  %v89_v25 = vld [vmem:[#allocation7 + $0x40] sm:$0xff]  ;;  %v90_v27 = vld [vmem:[#allocation7 + $0x48] sm:$0xff]  ;;  %v91_v34 = vld [vmem:[#allocation7 + $0x50] sm:$0xff]  ;;  %s11072_s28 = scalar_lea.vmem %s7151_s27, 16  ;;  %s11076_s12 = scalar_lea.vmem %s7151_s27, 32 }
  0x4d   :  { %v11214_v17 = vsub.f32 %v83_v2, %v108_v6  ;;  %v11216_v18 = vpack.c.bf16 %v111_v9, %v108_v6  ;;  %v11218_v19 = vsub.f32 %v84_v5, %v111_v9  ;;  %v11220_v20 = vsub.f32 %v85_v7, %v114_v10  ;;  %v73_v35 = vld [vmem:[#allocation2] sm:$0xff]  ;;  %v92_v36 = vld [vmem:[#allocation7 + $0x58] sm:$0xff]  ;;  %v94_v45 = vld [vmem:[#allocation7 + $0x68] sm:$0xff]  ;;  %p11073_p4 = scmp.ne.s32.totalorder %s7151_s27, %s11072_s28  ;;  %p11078_p6 = scmp.lt.s32.totalorder %s11076_s12, %s11072_s28 }
  0x4e   :  { %v11224_v21 = vpack.c.bf16 %v11212_v16, %v11210_v15  ;;  %v11226_v22 = vsub.f32 %v86_v8, %v117_v11  ;;  %v120_v23 = vand.u32 4294901760, %v87_v12  ;;  %v123_v24 = vand.u32 4294901760, %v88_v13  ;;  %9562 = vmatprep.subr.bf16.mxu1 %v11208_v14  ;;  %v93_v44 = vld [vmem:[#allocation7 + $0x60] sm:$0xff]  ;;  %v74_v49 = vld [vmem:[#allocation2 + $0x8] sm:$0xff]  ;;  %v95_v55 = vld [vmem:[#allocation7 + $0x70] sm:$0xff] }
  0x4f   :  { %v11231_v26 = vpack.c.bf16 %v11218_v19, %v11214_v17  ;;  %9564 = vmatpush3.bf16.msra.mxu1 %v11208_v14  ;;  %v11235_v28 = vpack.c.bf16 %v117_v11, %v114_v10  ;;  %v126_v29 = vand.u32 4294901760, %v89_v25  ;;  %v129_v33 = vand.u32 4294901760, %v90_v27  ;;  %v96_v56 = vld [vmem:[#allocation7 + $0x78] sm:$0xff]  ;;  %v75_v63 = vld [vmem:[#allocation2 + $0x10] sm:$0xff]  ;;  %p11079_p7 = por %p11078_p6, %p11077_p5 }
  0x50   :  { %9626 = vmatprep.subr.bf16.mxu0 %v11224_v21  ;;  %9566 = vmatprep.subr.bf16.mxu1 %v11216_v18  ;;  %v11242_v30 = vpack.c.bf16 %v11226_v22, %v11220_v20  ;;  %v11244_v31 = vsub.f32 %v87_v12, %v120_v23  ;;  %v11246_v32 = vsub.f32 %v88_v13, %v123_v24  ;;  %v132_v38 = vand.u32 4294901760, %v91_v34  ;;  %v76_v11 = vld [vmem:[#allocation2 + $0x18] sm:$0xff] }
  0x51   :  { %9628 = vmatpush3.bf16.msra.mxu0 %v11224_v21  ;;  %v11249_v37 = vpack.c.bf16 %v123_v24, %v120_v23  ;;  %v11253_v39 = vand.u32 4294901760, %v73_v35  ;;  %v11260_v41 = vsub.f32 %v89_v25, %v126_v29  ;;  %v11262_v42 = vsub.f32 %v90_v27, %v129_v33  ;;  %p11080_p8 = pnand %p11079_p7, %p11073_p4 }
  0x52   :  { %9630 = vmatprep.subr.bf16.mxu0 %v11231_v26  ;;  %v11258_v40 = vpack.c.bf16 %v11246_v32, %v11244_v31  ;;  %v135_v43 = vand.u32 4294901760, %v92_v36  ;;  %v11268_v47 = vpack.c.bf16 %v129_v33, %v126_v29  ;;  %v11272_v48 = vsub.f32 %v91_v34, %v132_v38 }
  0x53   :  { %9568 = vmatpush3.bf16.msra.mxu1 %v11216_v18  ;;  %v11265_v46 = vsub.f32 %v73_v35, %v11253_v39  ;;  %v11279_v51 = vpack.c.bf16 %v11262_v42, %v11260_v41  ;;  %v138_v53 = vand.u32 4294901760, %v93_v44  ;;  %v141_v54 = vand.u32 4294901760, %v94_v45 }
  0x54   :  { %9570 = vmatprep.subr.bf16.mxu1 %v11235_v28  ;;  %v11281_v52 = vsub.f32 %v92_v36, %v135_v43  ;;  %v225_v58 = vand.u32 4294901760, %v11210_v15  ;;  %v232_v59 = vand.u32 4294901760, %v11212_v16  ;;  %v11289_v60 = vpack.c.bf16 %v135_v43, %v132_v38 }
  0x55   :  { %9632 = vmatpush3.bf16.msra.mxu0 %v11231_v26  ;;  %8109 = vmatprep.mubr.f32.mxu0 %v11265_v46  ;;  %v184_v50 = vand.u32 4294901760, %v11265_v46  ;;  %v11291_v61 = vand.u32 4294901760, %v74_v49  ;;  %v144_v62 = vand.u32 4294901760, %v95_v55  ;;  %v11300_v2 = vsub.f32 %v93_v44, %v138_v53 }
  0x56   :  { %9634 = vmatprep.subr.bf16.mxu0 %v11242_v30  ;;  %v11298_v1 = vpack.c.bf16 %v11281_v52, %v11272_v48  ;;  %v11302_v3 = vsub.f32 %v94_v45, %v141_v54  ;;  %v147_v4 = vand.u32 4294901760, %v96_v56  ;;  %v226_v5 = vsub.f32 %v11210_v15, %v225_v58 }
  0x57   :  { %9572 = vmatpush3.bf16.msra.mxu1 %v11235_v28  ;;  %v185_v57 = vsub.f32 %v11265_v46, %v184_v50  ;;  %v233_v6 = vsub.f32 %v11212_v16, %v232_v59  ;;  %v239_v7 = vand.u32 4294901760, %v11214_v17  ;;  %v11312_v8 = vpack.c.bf16 %v141_v54, %v138_v53 }
  0x58   :  { %9574 = vmatprep.subr.bf16.mxu1 %v11249_v37  ;;  %v11315_v9 = vsub.f32 %v74_v49, %v11291_v61  ;;  %v11318_v10 = vand.u32 4294901760, %v75_v63  ;;  %v246_v12 = vand.u32 4294901760, %v11218_v19  ;;  %v11322_v13 = vsub.f32 %v95_v55, %v144_v62 }
  0x59   :  { %9636 = vmatpush3.bf16.msra.mxu0 %v11242_v30  ;;  %v186_v0 = vand.u32 4294901760, %v185_v57  ;;  %v11327_v23 = vpack.c.bf16 %v11302_v3, %v11300_v2  ;;  %v11329_v24 = vpack.c.bf16 %v147_v4, %v144_v62  ;;  %v11331_v25 = vsub.f32 %v96_v56, %v147_v4 }
  0x5a   :  { %9638 = vmatprep.subr.bf16.mxu0 %v11258_v40  ;;  %v194_v27 = vand.u32 4294901760, %v11315_v9  ;;  %v11335_v29 = vand.u32 4294901760, %v76_v11  ;;  %v227_v33 = vand.u32 4294901760, %v226_v5  ;;  %v234_v34 = vand.u32 4294901760, %v233_v6 }
  0x5b   :  { %9576 = vmatpush3.bf16.msra.mxu1 %v11249_v37  ;;  %8033 = vmatprep.mubr.f32.mxu1 %v186_v0  ;;  %12673 = vst [vmem:[#allocation15_spill] sm:$0xff] %v11327_v23  ;;  %v240_v35 = vsub.f32 %v11214_v17, %v239_v7  ;;  %v11342_v36 = vsub.f32 %v75_v63, %v11318_v10  ;;  %v12586_v43 = vand.u32 4294901760, %v11220_v20  ;;  %v12585_v44 = vand.u32 4294901760, %v11226_v22 }
  0x5c   :  { %9578 = vmatprep.subr.bf16.mxu1 %v11268_v47  ;;  %v247_v38 = vsub.f32 %v11218_v19, %v246_v12  ;;  %v11353_v45 = vpack.c.bf16 %v11331_v25, %v11322_v13  ;;  %v195_v49 = vsub.f32 %v11315_v9, %v194_v27  ;;  %v12588_v53 = vand.u32 4294901760, %v11244_v31 }
  0x5d   :  { %9640 = vmatpush3.bf16.msra.mxu0 %v11258_v40  ;;  %v12587_v54 = vand.u32 4294901760, %v11342_v36  ;;  %v11362_v55 = vsub.f32 %v76_v11, %v11335_v29  ;;  %v11364_v56 = vpack.c.bf16 %v234_v34, %v227_v33  ;;  %v241_v57 = vand.u32 4294901760, %v240_v35 }
  0x5e   :  { %9642 = vmatprep.subr.bf16.mxu0 %v11279_v51  ;;  %12674 = vst [vmem:[#allocation16_spill] sm:$0xff] %v11353_v45  ;;  %v274_v62 = vand.u32 4294901760, %v11246_v32  ;;  %v248_v63 = vand.u32 4294901760, %v247_v38  ;;  %v254_v0 = vsub.f32 %v11220_v20, %v12586_v43  ;;  %v261_v4 = vsub.f32 %v11226_v22, %v12585_v44 }
  0x5f   :  { %9580 = vmatpush3.bf16.msra.mxu1 %v11268_v47  ;;  %v205_v5 = vsub.f32 %v11342_v36, %v12587_v54  ;;  %v12589_v6 = vand.u32 4294901760, %v11362_v55  ;;  %v196_v11 = vand.u32 4294901760, %v195_v49  ;;  %v268_v33 = vsub.f32 %v11244_v31, %v12588_v53 }
  0x60   :  { %9582 = vmatprep.subr.bf16.mxu1 %v11289_v60  ;;  %v281_v34 = vand.u32 4294901760, %v11260_v41  ;;  %v12590_v35 = vand.u32 4294901760, %v11262_v42  ;;  %v11390_v43 = vpack.c.bf16 %v248_v63, %v241_v57  ;;  %v255_v49 = vand.u32 4294901760, %v254_v0 }
  0x61   :  { %9644 = vmatpush3.bf16.msra.mxu0 %v11279_v51  ;;  %v206_v38 = vand.u32 4294901760, %v205_v5  ;;  %v215_v44 = vsub.f32 %v11362_v55, %v12589_v6  ;;  %v262_v54 = vand.u32 4294901760, %v261_v4  ;;  %v275_v53 = vsub.f32 %v11246_v32, %v274_v62 }
  0x62   :  { %9646 = vmatprep.subr.bf16.mxu0 %v11298_v1  ;;  %v282_v6 = vsub.f32 %v11260_v41, %v281_v34  ;;  %v289_v57 = vsub.f32 %v11262_v42, %v12590_v35  ;;  %v12594_v63 = vand.u32 4294901760, %v11272_v48  ;;  %v323_v46 = vand.u32 4294901760, %v11322_v13 }
  0x63   :  { %9584 = vmatpush3.bf16.msra.mxu1 %v11289_v60  ;;  %v216_v5 = vand.u32 4294901760, %v215_v44  ;;  %v11407_v0 = vpack.c.bf16 %v262_v54, %v255_v49  ;;  %v269_v44 = vand.u32 4294901760, %v268_v33  ;;  %v276_v4 = vand.u32 4294901760, %v275_v53 }
  0x64   :  { %9586 = vmatprep.subr.bf16.mxu1 %v11312_v8  ;;  %v290_v35 = vand.u32 4294901760, %v289_v57  ;;  %v296_v54 = vsub.f32 %v11272_v48, %v12594_v63  ;;  %v12593_v33 = vand.u32 4294901760, %v11300_v2  ;;  %v12677_v15 = vand.u32 4294901760, %v11342_v36 }
  0x65   :  { %9648 = vmatpush3.bf16.msra.mxu0 %v11298_v1  ;;  %v11421_v53 = vpack.c.bf16 %v276_v4, %v269_v44  ;;  %v12678_v16 = vand.u32 4294901760, %v11220_v20  ;;  %v12679_v17 = vand.u32 4294901760, %v11226_v22  ;;  %v12684_v22 = vand.u32 4294901760, %v11262_v42 }
  0x66   :  { %9650 = vmatprep.subr.bf16.mxu0 %v11327_v23  ;;  %v297_v57 = vand.u32 4294901760, %v296_v54  ;;  %v310_v44 = vsub.f32 %v11300_v2, %v12593_v33  ;;  %v12687_v32 = vand.u32 4294901760, %v11281_v52  ;;  %v12689_v41 = vand.u32 4294901760, %v11300_v2 }
  0x67   :  { %9588 = vmatpush3.bf16.msra.mxu1 %v11312_v8  ;;  %v11496_v19 = vpack.c.bf16 %v12679_v17, %v12678_v16  ;;  %v12690_v42 = vand.u32 4294901760, %v11302_v3 }
  0x68   :  { %9590 = vmatprep.subr.bf16.mxu1 %v11329_v24 }
  0x69   :  { %9652 = vmatpush3.bf16.msra.mxu0 %v11327_v23  ;;  %12680 = vst [vmem:[#allocation19_spill] sm:$0xff] %v11496_v19 }
  0x6a   :  { %9654 = vmatprep.subr.bf16.mxu0 %v11353_v45 }
  0x6b   :  { %9592 = vmatpush3.bf16.msra.mxu1 %v11329_v24 }
  0x6c   :  { %9594 = vmatprep.subr.bf16.mxu1 %v11364_v56 }
  0x6d   :  { %9656 = vmatpush3.bf16.msra.mxu0 %v11353_v45 }
  0x6e   :  { %9658 = vmatprep.subr.bf16.mxu0 %v11208_v14  ;;  %8034 = vmatmul.mubr.f32.vlgmr.msra.gmra.mrb[0].mxu1 %v196_v11  ;;  %v12591_v11 = vand.u32 4294901760, %v11281_v52 }
  0x6f   :  { %9596 = vmatpush3.bf16.msra.mxu1 %v11364_v56  ;;  %8036 = vmatprep.mubr.f32.mxu1 %v206_v38  ;;  %v283_v38 = vand.u32 4294901760, %v282_v6  ;;  %v12592_v6 = vand.u32 4294901760, %v11302_v3 }
  0x70   :  { %8110 = vmatmul.mubr.f32.vlgmr.msra.gmra.mrb[0].mxu0 %v11315_v9  ;;  %9598 = vmatprep.subr.bf16.mxu1 %v11390_v43  ;;  %v303_v49 = vsub.f32 %v11281_v52, %v12591_v11 }
  0x71   :  { %9660 = vmatpush3.bf16.msra.mxu0 %v11208_v14  ;;  %8112 = vmatprep.mubr.f32.mxu0 %v11342_v36  ;;  %v317_v11 = vsub.f32 %v11302_v3, %v12592_v6 }
  0x72   :  { %9662 = vmatprep.subr.bf16.mxu0 %v11216_v18  ;;  %8037 = vmatmul.mubr.f32.gmra.mrb[2].mxu1 %v216_v5  ;;  %v11432_v5 = vpack.c.bf16 %v290_v35, %v283_v38  ;;  %v304_v4 = vand.u32 4294901760, %v303_v49  ;;  %v311_v35 = vand.u32 4294901760, %v310_v44  ;;  %v324_v49 = vsub.f32 %v11322_v13, %v323_v46 }
  0x73   :  { %9600 = vmatpush3.bf16.msra.mxu1 %v11390_v43  ;;  %8071 = vmatprep.mubr.f32.mxu1 %v11253_v39  ;;  %v318_v54 = vand.u32 4294901760, %v317_v11  ;;  %v99_v11 = vld [vmem:[#allocation8 + $0x10] sm:$0xff] }
  0x74   :  { %8113 = vmatmul.mubr.f32.gmra.mrb[2].mxu0 %v11362_v55  ;;  %9602 = vmatprep.subr.bf16.mxu1 %v11407_v0  ;;  %v11447_v38 = vpack.c.bf16 %v304_v4, %v297_v57  ;;  %v325_v44 = vand.u32 4294901760, %v324_v49  ;;  %v879_v57 = vsel %vm871_vm0, %v99_v11, 0  ;;  %v100_v4 = vld [vmem:[#allocation8 + $0x18] sm:$0xff] }
  0x75   :  { %9664 = vmatpush3.bf16.msra.mxu0 %v11216_v18  ;;  %8147 = vmatprep.mubr.f32.mxu0 %v184_v50  ;;  %v330_v50 = vand.u32 4294901760, %v11331_v25  ;;  %v11455_v33 = vpack.c.bf16 %v318_v54, %v311_v35  ;;  %v882_v35 = vsel %vm871_vm0, %v100_v4, 0 }
  0x76   :  { %9666 = vmatprep.subr.bf16.mxu0 %v11235_v28 }
  0x77   :  { %9604 = vmatpush3.bf16.msra.mxu1 %v11407_v0  ;;  %v331_v6 = vsub.f32 %v11331_v25, %v330_v50  ;;  %v11473_v25 = vpack.c.bf16 %v232_v59, %v225_v58  ;;  %v12681_v58 = vand.u32 4294901760, %v11362_v55  ;;  %v12682_v59 = vand.u32 4294901760, %v11244_v31 }
  0x78   :  { %9606 = vmatprep.subr.bf16.mxu1 %v11421_v53  ;;  %v12686_v31 = vand.u32 4294901760, %v11272_v48 }
  0x79   :  { %9668 = vmatpush3.bf16.msra.mxu0 %v11235_v28  ;;  %v332_v63 = vand.u32 4294901760, %v331_v6  ;;  %12675 = vst [vmem:[#allocation17_spill] sm:$0xff] %v11473_v25  ;;  %v11508_v20 = vpack.c.bf16 %v274_v62, %v12682_v59 }
  0x7a   :  { %9670 = vmatprep.subr.bf16.mxu0 %v11249_v37  ;;  %v11524_v9 = vpack.c.bf16 %v12687_v32, %v12686_v31 }
  0x7b   :  { %9608 = vmatpush3.bf16.msra.mxu1 %v11421_v53  ;;  %v11461_v13 = vpack.c.bf16 %v332_v63, %v325_v44  ;;  %v11482_v63 = vpack.c.bf16 %v246_v12, %v239_v7  ;;  %12683 = vst [vmem:[#allocation20_spill] sm:$0xff] %v11508_v20  ;;  %v11516_v7 = vpack.c.bf16 %v12684_v22, %v281_v34  ;;  %v98_v34 = vld [vmem:[#allocation8 + $0x8] sm:$0xff]  ;;  %v11589_v44 = vand.u32 4294901760, %v882_v35 }
  0x7c   :  { %9610 = vmatprep.subr.bf16.mxu1 %v11432_v5  ;;  %12688 = vst [vmem:[#allocation22_spill] sm:$0xff] %v11524_v9  ;;  %v11532_v12 = vpack.c.bf16 %v12690_v42, %v12689_v41  ;;  %v876_v6 = vsel %vm871_vm0, %v98_v34, 0 }
  0x7d   :  { %9672 = vmatpush3.bf16.msra.mxu0 %v11249_v37  ;;  %12676 = vst [vmem:[#allocation18_spill] sm:$0xff] %v11482_v63  ;;  %12685 = vst [vmem:[#allocation21_spill] sm:$0xff] %v11516_v7  ;;  %v11598_v41 = vsub.f32 %v882_v35, %v11589_v44 }
  0x7e   :  { %9674 = vmatprep.subr.bf16.mxu0 %v11268_v47  ;;  %12691 = vst [vmem:[#allocation23_spill] sm:$0xff] %v11532_v12 }
  0x7f   :  { %9612 = vmatpush3.bf16.msra.mxu1 %v11432_v5  ;;  %v11609_v35 = vand.u32 4294901760, %v11598_v41 }
  0x80   :  { %9614 = vmatprep.subr.bf16.mxu1 %v11447_v38 }
  0x81   :  { %9676 = vmatpush3.bf16.msra.mxu0 %v11268_v47 }
  0x82   :  { %9678 = vmatprep.subr.bf16.mxu0 %v11289_v60 }
  0x83   :  { %9616 = vmatpush3.bf16.msra.mxu1 %v11447_v38 }
  0x84   :  { %9618 = vmatprep.subr.bf16.mxu1 %v11455_v33 }
  0x85   :  { %9680 = vmatpush3.bf16.msra.mxu0 %v11289_v60 }
  0x86   :  { %9682 = vmatprep.subr.bf16.mxu0 %v11312_v8 }
  0x87   :  { %9620 = vmatpush3.bf16.msra.mxu1 %v11455_v33 }
  0x88   :  { %9622 = vmatprep.subr.bf16.mxu1 %v11461_v13 }
  0x89   :  { %9684 = vmatpush3.bf16.msra.mxu0 %v11312_v8 }
  0x8a   :  { %9686 = vmatprep.subr.bf16.mxu0 %v11329_v24 }
  0x8b   :  { %9624 = vmatpush3.bf16.msra.mxu1 %v11461_v13 }
  0x8d   :  { %9688 = vmatpush3.bf16.msra.mxu0 %v11329_v24 }
  0x8e   :  { %9690 = vmatprep.subr.bf16.mxu0 %v11473_v25  ;;  %8072 = vmatmul.mubr.f32.vlgmr.msra.gmra.mrb[0].mxu1 %v11291_v61 }
  0x8f   :  { %8074 = vmatprep.mubr.f32.mxu1 %v11318_v10 }
  0x90   :  { %8148 = vmatmul.mubr.f32.vlgmr.msra.gmra.mrb[0].mxu0 %v194_v27  ;;  %v11536_v27 = vpack.c.bf16 %v330_v50, %v323_v46  ;;  %v11581_v46 = vand.u32 4294901760, %v876_v6  ;;  %v11583_v50 = vand.u32 4294901760, %v879_v57 }
  0x91   :  { %9692 = vmatpush3.bf16.msra.mxu0 %v11473_v25  ;;  %8150 = vmatprep.mubr.f32.mxu0 %v12677_v15 }
  0x92   :  { %9694 = vmatprep.subr.bf16.mxu0 %v11482_v63  ;;  %8075 = vmatmul.mubr.f32.gmra.mrb[2].mxu1 %v11335_v29  ;;  %12692 = vst [vmem:[#allocation24_spill] sm:$0xff] %v11536_v27  ;;  %v11587_v54 = vsub.f32 %v876_v6, %v11581_v46  ;;  %v11592_v17 = vsub.f32 %v879_v57, %v11583_v50 }
  0x94   :  { %8151 = vmatmul.mubr.f32.gmra.mrb[2].mxu0 %v12681_v58  ;;  %v11595_v22 = vand.u32 4294901760, %v11587_v54 }
  0x95   :  { %9696 = vmatpush3.bf16.msra.mxu0 %v11482_v63  ;;  %8185 = vmatprep.mubr.f32.mxu0 %v11253_v39 }
  0x96   :  { %9698 = vmatprep.subr.bf16.mxu0 %v11496_v19  ;;  %v966_v57 = vsub.f32 %v11587_v54, %v11595_v22 }
  0x99   :  { %9700 = vmatpush3.bf16.msra.mxu0 %v11496_v19 }
  0x9a   :  { %9702 = vmatprep.subr.bf16.mxu0 %v11508_v20 }
  0x9d   :  { %9704 = vmatpush3.bf16.msra.mxu0 %v11508_v20 }
  0x9e   :  { %9706 = vmatprep.subr.bf16.mxu0 %v11516_v7 }
  0xa1   :  { %9708 = vmatpush3.bf16.msra.mxu0 %v11516_v7 }
  0xa2   :  { %9710 = vmatprep.subr.bf16.mxu0 %v11524_v9 }
  0xa5   :  { %9712 = vmatpush3.bf16.msra.mxu0 %v11524_v9 }
  0xa6   :  { %9714 = vmatprep.subr.bf16.mxu0 %v11532_v12 }
  0xa9   :  { %9716 = vmatpush3.bf16.msra.mxu0 %v11532_v12 }
  0xaa   :  { %9718 = vmatprep.subr.bf16.mxu0 %v11536_v27 }
  0xad   :  { %9720 = vmatpush3.bf16.msra.mxu0 %v11536_v27 }
  0xae   :  { %9722 = vmatprep.subr.bf16.mxu0 %v11208_v14 }
  0xb0   :  { %8186 = vmatmul.mubr.f32.vlgmr.msra.gmra.mrb[0].mxu0 %v11291_v61 }
  0xb1   :  { %9724 = vmatpush3.bf16.msra.mxu0 %v11208_v14  ;;  %8188 = vmatprep.mubr.f32.mxu0 %v11318_v10 }
  0xb2   :  { %9726 = vmatprep.subr.bf16.mxu0 %v11216_v18 }
  0xb4   :  { %8189 = vmatmul.mubr.f32.gmra.mrb[2].mxu0 %v11335_v29 }
  0xb5   :  { %9728 = vmatpush3.bf16.msra.mxu0 %v11216_v18  ;;  %8223 = vmatprep.mubr.f32.mxu0 %v11253_v39  ;;  %v97_v39 = vld [vmem:[#allocation8] sm:$0xff] }
  0xb6   :  { %9730 = vmatprep.subr.bf16.mxu0 %v11235_v28  ;;  %v873_v48 = vsel %vm871_vm0, %v97_v39, 0 }
  0xb7   :  { %v11565_v52 = vand.u32 4294901760, %v873_v48 }
  0xb9   :  { %9732 = vmatpush3.bf16.msra.mxu0 %v11235_v28  ;;  %v11568_v2 = vsub.f32 %v873_v48, %v11565_v52 }
  0xba   :  { %9734 = vmatprep.subr.bf16.mxu0 %v11249_v37 }
  0xbb   :  { %v11572_v3 = vand.u32 4294901760, %v11568_v2 }
  0xbd   :  { %9736 = vmatpush3.bf16.msra.mxu0 %v11249_v37 }
  0xbe   :  { %9738 = vmatprep.subr.bf16.mxu0 %v11268_v47 }
  0xc1   :  { %9740 = vmatpush3.bf16.msra.mxu0 %v11268_v47 }
  0xc2   :  { %9742 = vmatprep.subr.bf16.mxu0 %v11289_v60 }
  0xc5   :  { %9744 = vmatpush3.bf16.msra.mxu0 %v11289_v60 }
  0xc6   :  { %9746 = vmatprep.subr.bf16.mxu0 %v11312_v8 }
  0xc9   :  { %9748 = vmatpush3.bf16.msra.mxu0 %v11312_v8 }
  0xca   :  { %9750 = vmatprep.subr.bf16.mxu0 %v11329_v24 }
  0xcd   :  { %9752 = vmatpush3.bf16.msra.mxu0 %v11329_v24 }
  0xd0   :  { %8224 = vmatmul.mubr.f32.vlgmr.msra.gmra.mrb[0].mxu0 %v11291_v61  ;;  %v956_v61 = vsub.f32 %v11568_v2, %v11572_v3 }
  0xd1   :  { %8226 = vmatprep.mubr.f32.mxu0 %v11318_v10 }
  0xd2   :  { %v11576_v10 = vand.u32 4294901760, %v956_v61  ;;  %v11601_v61 = vand.u32 4294901760, %v11592_v17 }
  0xd4   :  { %8227 = vmatmul.mubr.f32.gmra.mrb[2].mxu0 %v11335_v29  ;;  %12693 = vst [vmem:[#allocation25_spill] sm:$0xff] %v11576_v10  ;;  %8237 = vmatprep.mubr.f32.mxu1 %v11576_v10  ;;  %v11616_v10 = vand.u32 4294901760, %v966_v57 }
  0xd5   :  { %8563 = vmatprep.mubr.f32.mxu0 %v11565_v52 }
 0x161   :  { %v8073_v29 = vpop.f32.mrb[0].mxu1 }
 0x162   :  { %v369_v36 = vpop.f32.mrb[1].mxu1 }
 0x165   :  { %v8076_v55 = vpop.f32.mrb[2].mxu1 }
 0x166   :  { %v381_v62 = vpop.f32.mrb[3].mxu1 }
 0x1a3   :  { %v8225_v49 = vpop.f32.mrb[0].mxu0 }
 0x1a4   :  { %v10761_v15 = vadd.f32 %v8225_v49, %v8073_v29  ;;  %v849_v16 = vpop.f32.mrb[1].mxu0 }
 0x1a5   :  { %v10762_v58 = vadd.f32 %v849_v16, %v369_v36 }
 0x1a6   :  { %v888_v59 = vand.u32 4294901760, %v10761_v15 }
 0x1a7   :  { %v885_v31 = vand.u32 4294901760, %v10762_v58  ;;  %v8228_v32 = vpop.f32.mrb[2].mxu0 }
 0x1a8   :  { %v1002_v42 = vsub.f32 %v10761_v15, %v888_v59  ;;  %v10763_v39 = vadd.f32 %v8228_v32, %v8076_v55  ;;  %v861_v48 = vpop.f32.mrb[3].mxu0 }
 0x1a9   :  { %v11603_v29 = vpack.c.bf16 %v888_v59, %v885_v31  ;;  %v995_v34 = vsub.f32 %v10762_v58, %v885_v31  ;;  %v10764_v11 = vadd.f32 %v861_v48, %v381_v62  ;;  %v976_v62 = vsub.f32 %v11592_v17, %v11601_v61 }
 0x1aa   :  { %v1003_v36 = vand.u32 4294901760, %v1002_v42  ;;  %v894_v6 = vand.u32 4294901760, %v10763_v39 }
 0x1ab   :  { %v996_v4 = vand.u32 4294901760, %v995_v34  ;;  %v891_v49 = vand.u32 4294901760, %v10764_v11  ;;  %9754 = vmatprep.subr.bf16.mxu1 %v11603_v29  ;;  %v9769_v55 = vpack.c.bf16 %v1002_v42, %v995_v34  ;;  %v11622_v7 = vand.u32 4294901760, %v976_v62  ;;  %v11675_v62 = vld [vmem:[#allocation5 + $0x8] sm:$0xff] }
 0x1ac   :  { %v1016_v15 = vsub.f32 %v10763_v39, %v894_v6  ;;  %9756 = vmatpush3.bf16.msra.mxu1 %v11603_v29  ;;  %v1004_v16 = vsub.f32 %v1002_v42, %v1003_v36  ;;  %v986_v39 = vsub.f32 %v11598_v41, %v11609_v35  ;;  %12695 = vst [vmem:[#allocation27_spill] sm:$0xff] %v11675_v62 }
 0x1ad   :  { %v11614_v58 = vpack.c.bf16 %v894_v6, %v891_v49  ;;  %v1009_v59 = vsub.f32 %v10764_v11, %v891_v49  ;;  %v997_v31 = vsub.f32 %v995_v34, %v996_v4  ;;  %v9785_v32 = vpack.c.bf16 %v1003_v36, %v996_v4 }
 0x1ae   :  { %v1017_v48 = vand.u32 4294901760, %v1016_v15  ;;  %v1005_v27 = vand.u32 4294901760, %v1004_v16  ;;  %v11625_v57 = vand.u32 4294901760, %v986_v39 }
 0x1af   :  { %v1010_v12 = vand.u32 4294901760, %v1009_v59  ;;  %9758 = vmatprep.subr.bf16.mxu1 %v11614_v58  ;;  %v998_v9 = vand.u32 4294901760, %v997_v31  ;;  %v9773_v42 = vpack.c.bf16 %v1016_v15, %v1009_v59 }
 0x1b0   :  { %9760 = vmatpush3.bf16.msra.mxu1 %v11614_v58  ;;  %v1018_v6 = vsub.f32 %v1016_v15, %v1017_v48 }
 0x1b1   :  { %v9761_v11 = vpack.c.bf16 %v1005_v27, %v998_v9  ;;  %v1011_v34 = vsub.f32 %v1009_v59, %v1010_v12  ;;  %v9789_v36 = vpack.c.bf16 %v1017_v48, %v1010_v12  ;;  %v11642_v9 = vld [vmem:[#allocation5] sm:$0xff]  ;;  %v11682_v59 = vand.u32 4294901760, %v11675_v62 }
 0x1b2   :  { %v1019_v4 = vand.u32 4294901760, %v1018_v6  ;;  %12694 = vst [vmem:[#allocation26_spill] sm:$0xff] %v11642_v9  ;;  %v11647_v12 = vand.u32 4294901760, %v11642_v9 }
 0x1b3   :  { %8238 = vmatmul.mubr.f32.vlgmr.msra.gmra.mrb[4].mxu1 %v11616_v10  ;;  %9762 = vmatprep.subr.bf16.mxu1 %v9761_v11  ;;  %v1012_v49 = vand.u32 4294901760, %v1011_v34  ;;  %v11693_v48 = vsub.f32 %v11675_v62, %v11682_v59 }
 0x1b4   :  { %9764 = vmatpush3.bf16.msra.mxu1 %v9761_v11  ;;  %8240 = vmatprep.mubr.f32.mxu1 %v11622_v7  ;;  %v11653_v27 = vsub.f32 %v11642_v9, %v11647_v12 }
 0x1b5   :  { %v9765_v16 = vpack.c.bf16 %v1019_v4, %v1012_v49  ;;  %v12605_v6 = vand.u32 4294901760, %v11693_v48 }
 0x1b7   :  { %8241 = vmatmul.mubr.f32.gmra.mrb[6].mxu1 %v11625_v57  ;;  %9766 = vmatprep.subr.bf16.mxu1 %v9765_v16 }
 0x1b8   :  { %9768 = vmatpush3.bf16.msra.mxu1 %v9765_v16  ;;  %8251 = vmatprep.mubr.f32.mxu1 %v11565_v52 }
 0x1b9   :  { %9770 = vmatprep.subr.bf16.mxu1 %v9769_v55 }
 0x1bb   :  { %8252 = vmatmul.mubr.f32.vlgmr.msra.gmra.mrb[4].mxu1 %v11581_v46 }
 0x1bc   :  { %9772 = vmatpush3.bf16.msra.mxu1 %v9769_v55  ;;  %8254 = vmatprep.mubr.f32.mxu1 %v11583_v50  ;;  %v1581_v55 = vand.u32 4294901760, %v11653_v27 }
 0x1bd   :  { %9774 = vmatprep.subr.bf16.mxu1 %v9773_v42 }
 0x1be   :  { %v1582_v15 = vsub.f32 %v11653_v27, %v1581_v55 }
 0x1bf   :  { %8255 = vmatmul.mubr.f32.gmra.mrb[6].mxu1 %v11589_v44 }
 0x1c0   :  { %9776 = vmatpush3.bf16.msra.mxu1 %v9773_v42  ;;  %8265 = vmatprep.mubr.f32.mxu1 %v11568_v2 }
 0x1c1   :  { %9778 = vmatprep.subr.bf16.mxu1 %v11603_v29 }
 0x1c3   :  { %8266 = vmatmul.mubr.f32.vlgmr.msra.gmra.mrb[4].mxu1 %v11587_v54 }
 0x1c4   :  { %9780 = vmatpush3.bf16.msra.mxu1 %v11603_v29  ;;  %8268 = vmatprep.mubr.f32.mxu1 %v11592_v17 }
 0x1c5   :  { %9782 = vmatprep.subr.bf16.mxu1 %v11614_v58 }
 0x1c7   :  { %8269 = vmatmul.mubr.f32.gmra.mrb[6].mxu1 %v11598_v41 }
 0x1c8   :  { %9784 = vmatpush3.bf16.msra.mxu1 %v11614_v58  ;;  %8279 = vmatprep.mubr.f32.mxu1 %v11572_v3 }
 0x1c9   :  { %9786 = vmatprep.subr.bf16.mxu1 %v9785_v32 }
 0x1cb   :  { %8280 = vmatmul.mubr.f32.vlgmr.msra.gmra.mrb[4].mxu1 %v11595_v22 }
 0x1cc   :  { %9788 = vmatpush3.bf16.msra.mxu1 %v9785_v32  ;;  %8282 = vmatprep.mubr.f32.mxu1 %v11601_v61  ;;  %v11688_v32 = vld [vmem:[#allocation5 + $0x18] sm:$0xff] }
 0x1cd   :  { %9790 = vmatprep.subr.bf16.mxu1 %v9789_v36  ;;  %12697 = vst [vmem:[#allocation29_spill] sm:$0xff] %v11688_v32  ;;  %v11696_v39 = vand.u32 4294901760, %v11688_v32 }
 0x1cf   :  { %8283 = vmatmul.mubr.f32.gmra.mrb[6].mxu1 %v11609_v35  ;;  %v11707_v11 = vsub.f32 %v11688_v32, %v11696_v39 }
 0x1d0   :  { %9792 = vmatpush3.bf16.msra.mxu1 %v9789_v36  ;;  %8293 = vmatprep.mubr.f32.mxu1 %v11565_v52  ;;  %v1592_v36 = vsub.f32 %v11693_v48, %v12605_v6 }
 0x1d1   :  { %9794 = vmatprep.subr.bf16.mxu1 %v11603_v29  ;;  %v1611_v4 = vand.u32 4294901760, %v11707_v11 }
 0x1d2   :  { %v1593_v16 = vand.u32 4294901760, %v1592_v36 }
 0x1d3   :  { %8294 = vmatmul.mubr.f32.vlgmr.msra.gmra.mrb[4].mxu1 %v11581_v46 }
 0x1d4   :  { %9796 = vmatpush3.bf16.msra.mxu1 %v11603_v29  ;;  %8296 = vmatprep.mubr.f32.mxu1 %v11583_v50  ;;  %v1583_v29 = vand.u32 4294901760, %v1582_v15  ;;  %v1612_v15 = vsub.f32 %v11707_v11, %v1611_v4 }
 0x1d5   :  { %9798 = vmatprep.subr.bf16.mxu1 %v11614_v58 }
 0x1d6   :  { %v1613_v6 = vand.u32 4294901760, %v1612_v15 }
 0x1d7   :  { %8297 = vmatmul.mubr.f32.gmra.mrb[6].mxu1 %v11589_v44 }
 0x1d8   :  { %9800 = vmatpush3.bf16.msra.mxu1 %v11614_v58  ;;  %8307 = vmatprep.mubr.f32.mxu1 %v11565_v52  ;;  %v11679_v58 = vld [vmem:[#allocation5 + $0x10] sm:$0xff] }
 0x1d9   :  { %9802 = vmatprep.subr.bf16.mxu1 %v11208_v14  ;;  %12696 = vst [vmem:[#allocation28_spill] sm:$0xff] %v11679_v58  ;;  %v11686_v31 = vand.u32 4294901760, %v11679_v58 }
 0x1db   :  { %8308 = vmatmul.mubr.f32.vlgmr.msra.gmra.mrb[4].mxu1 %v11581_v46  ;;  %v11701_v42 = vsub.f32 %v11679_v58, %v11686_v31 }
 0x1dc   :  { %9804 = vmatpush3.bf16.msra.mxu1 %v11208_v14  ;;  %8310 = vmatprep.mubr.f32.mxu1 %v11583_v50 }
 0x1dd   :  { %9806 = vmatprep.subr.bf16.mxu1 %v11216_v18  ;;  %v1601_v34 = vand.u32 4294901760, %v11701_v42 }
 0x1df   :  { %8311 = vmatmul.mubr.f32.gmra.mrb[6].mxu1 %v11589_v44  ;;  %v1602_v49 = vsub.f32 %v11701_v42, %v1601_v34 }
 0x1e0   :  { %9808 = vmatpush3.bf16.msra.mxu1 %v11216_v18  ;;  %8345 = vmatprep.mubr.f32.mxu1 %v1583_v29 }
 0x1e1   :  { %9810 = vmatprep.subr.bf16.mxu1 %v11235_v28  ;;  %v1603_v29 = vand.u32 4294901760, %v1602_v49 }
 0x1e4   :  { %9812 = vmatpush3.bf16.msra.mxu1 %v11235_v28 }
 0x1e5   :  { %9814 = vmatprep.subr.bf16.mxu1 %v11249_v37 }
 0x1e8   :  { %9816 = vmatpush3.bf16.msra.mxu1 %v11249_v37 }
 0x1e9   :  { %9818 = vmatprep.subr.bf16.mxu1 %v11268_v47 }
 0x1ec   :  { %9820 = vmatpush3.bf16.msra.mxu1 %v11268_v47 }
 0x1ed   :  { %9822 = vmatprep.subr.bf16.mxu1 %v11289_v60 }
 0x1f0   :  { %9824 = vmatpush3.bf16.msra.mxu1 %v11289_v60 }
 0x1f1   :  { %9826 = vmatprep.subr.bf16.mxu1 %v11312_v8 }
 0x1f4   :  { %9828 = vmatpush3.bf16.msra.mxu1 %v11312_v8 }
 0x1f5   :  { %9830 = vmatprep.subr.bf16.mxu1 %v11329_v24 }
 0x1f8   :  { %9832 = vmatpush3.bf16.msra.mxu1 %v11329_v24 }
 0x1f9   :  { %9834 = vmatprep.subr.bf16.mxu1 %v11364_v56 }
 0x1fb   :  { %8346 = vmatmul.mubr.f32.vlgmr.msra.gmra.mrb[8].mxu1 %v1593_v16 }
 0x1fc   :  { %9836 = vmatpush3.bf16.msra.mxu1 %v11364_v56  ;;  %8348 = vmatprep.mubr.f32.mxu1 %v1603_v29 }
 0x1fd   :  { %9838 = vmatprep.subr.bf16.mxu1 %v11390_v43 }
 0x1ff   :  { %8349 = vmatmul.mubr.f32.gmra.mrb[10].mxu1 %v1613_v6  ;;  %v12702_v6 = vld [vmem:[#allocation24_spill] sm:$0xff] }
 0x200   :  { %9840 = vmatpush3.bf16.msra.mxu1 %v11390_v43  ;;  %8383 = vmatprep.mubr.f32.mxu1 %v11647_v12 }
 0x201   :  { %9842 = vmatprep.subr.bf16.mxu1 %v11407_v0 }
 0x204   :  { %9844 = vmatpush3.bf16.msra.mxu1 %v11407_v0 }
 0x205   :  { %9846 = vmatprep.subr.bf16.mxu1 %v11421_v53 }
 0x208   :  { %9848 = vmatpush3.bf16.msra.mxu1 %v11421_v53 }
 0x209   :  { %9850 = vmatprep.subr.bf16.mxu1 %v11432_v5 }
 0x20c   :  { %9852 = vmatpush3.bf16.msra.mxu1 %v11432_v5 }
 0x20d   :  { %9854 = vmatprep.subr.bf16.mxu1 %v11447_v38 }
 0x210   :  { %9856 = vmatpush3.bf16.msra.mxu1 %v11447_v38 }
 0x211   :  { %9858 = vmatprep.subr.bf16.mxu1 %v11455_v33 }
 0x214   :  { %9860 = vmatpush3.bf16.msra.mxu1 %v11455_v33 }
 0x215   :  { %9862 = vmatprep.subr.bf16.mxu1 %v11461_v13 }
 0x218   :  { %9864 = vmatpush3.bf16.msra.mxu1 %v11461_v13 }
 0x219   :  { %9866 = vmatprep.subr.bf16.mxu1 %v11224_v21 }
 0x21b   :  { %8384 = vmatmul.mubr.f32.vlgmr.msra.gmra.mrb[8].mxu1 %v11682_v59 }
 0x21c   :  { %9868 = vmatpush3.bf16.msra.mxu1 %v11224_v21  ;;  %8386 = vmatprep.mubr.f32.mxu1 %v11686_v31 }
 0x21d   :  { %9870 = vmatprep.subr.bf16.mxu1 %v11231_v26 }
 0x21f   :  { %8387 = vmatmul.mubr.f32.gmra.mrb[10].mxu1 %v11696_v39 }
 0x220   :  { %9872 = vmatpush3.bf16.msra.mxu1 %v11231_v26  ;;  %8421 = vmatprep.mubr.f32.mxu1 %v11653_v27  ;;  %v12698_v27 = vand.u32 4294901760, %v11693_v48 }
 0x221   :  { %9874 = vmatprep.subr.bf16.mxu1 %v11242_v30 }
 0x224   :  { %9876 = vmatpush3.bf16.msra.mxu1 %v11242_v30 }
 0x225   :  { %9878 = vmatprep.subr.bf16.mxu1 %v11258_v40 }
 0x228   :  { %9880 = vmatpush3.bf16.msra.mxu1 %v11258_v40 }
 0x229   :  { %9882 = vmatprep.subr.bf16.mxu1 %v11279_v51 }
 0x22c   :  { %9884 = vmatpush3.bf16.msra.mxu1 %v11279_v51 }
 0x22d   :  { %9886 = vmatprep.subr.bf16.mxu1 %v11298_v1 }
 0x230   :  { %9888 = vmatpush3.bf16.msra.mxu1 %v11298_v1 }
 0x231   :  { %9890 = vmatprep.subr.bf16.mxu1 %v11327_v23 }
 0x234   :  { %9892 = vmatpush3.bf16.msra.mxu1 %v11327_v23 }
 0x235   :  { %9894 = vmatprep.subr.bf16.mxu1 %v11353_v45 }
 0x238   :  { %9896 = vmatpush3.bf16.msra.mxu1 %v11353_v45 }
 0x239   :  { %9898 = vmatprep.subr.bf16.mxu1 %v11208_v14 }
 0x23b   :  { %8422 = vmatmul.mubr.f32.vlgmr.msra.gmra.mrb[8].mxu1 %v11693_v48  ;;  %v12700_v48 = vld [vmem:[#allocation22_spill] sm:$0xff] }
 0x23c   :  { %9900 = vmatpush3.bf16.msra.mxu1 %v11208_v14  ;;  %8424 = vmatprep.mubr.f32.mxu1 %v11701_v42  ;;  %v12701_v42 = vld [vmem:[#allocation23_spill] sm:$0xff] }
 0x23d   :  { %9902 = vmatprep.subr.bf16.mxu1 %v11216_v18 }
 0x23f   :  { %8425 = vmatmul.mubr.f32.gmra.mrb[10].mxu1 %v11707_v11 }
 0x240   :  { %9904 = vmatpush3.bf16.msra.mxu1 %v11216_v18  ;;  %8459 = vmatprep.mubr.f32.mxu1 %v1581_v55  ;;  %v12699_v55 = vld [vmem:[#allocation21_spill] sm:$0xff] }
 0x241   :  { %9906 = vmatprep.subr.bf16.mxu1 %v11235_v28 }
 0x244   :  { %9908 = vmatpush3.bf16.msra.mxu1 %v11235_v28 }
 0x245   :  { %9910 = vmatprep.subr.bf16.mxu1 %v11249_v37 }
 0x248   :  { %9912 = vmatpush3.bf16.msra.mxu1 %v11249_v37 }
 0x249   :  { %9914 = vmatprep.subr.bf16.mxu1 %v11268_v47 }
 0x24c   :  { %9916 = vmatpush3.bf16.msra.mxu1 %v11268_v47 }
 0x24d   :  { %9918 = vmatprep.subr.bf16.mxu1 %v11289_v60 }
 0x250   :  { %9920 = vmatpush3.bf16.msra.mxu1 %v11289_v60 }
 0x251   :  { %9922 = vmatprep.subr.bf16.mxu1 %v11312_v8 }
 0x254   :  { %9924 = vmatpush3.bf16.msra.mxu1 %v11312_v8 }
 0x255   :  { %9926 = vmatprep.subr.bf16.mxu1 %v11329_v24 }
 0x258   :  { %9928 = vmatpush3.bf16.msra.mxu1 %v11329_v24 }
 0x259   :  { %9930 = vmatprep.subr.bf16.mxu1 %v11473_v25 }
 0x25b   :  { %8460 = vmatmul.mubr.f32.vlgmr.msra.gmra.mrb[8].mxu1 %v12698_v27 }
 0x25c   :  { %9932 = vmatpush3.bf16.msra.mxu1 %v11473_v25  ;;  %8462 = vmatprep.mubr.f32.mxu1 %v1601_v34 }
 0x25d   :  { %9934 = vmatprep.subr.bf16.mxu1 %v11482_v63 }
 0x25f   :  { %8463 = vmatmul.mubr.f32.gmra.mrb[10].mxu1 %v1611_v4 }
 0x260   :  { %9936 = vmatpush3.bf16.msra.mxu1 %v11482_v63  ;;  %8497 = vmatprep.mubr.f32.mxu1 %v11647_v12 }
 0x261   :  { %9938 = vmatprep.subr.bf16.mxu1 %v11496_v19 }
 0x264   :  { %9940 = vmatpush3.bf16.msra.mxu1 %v11496_v19 }
 0x265   :  { %9942 = vmatprep.subr.bf16.mxu1 %v11508_v20 }
 0x268   :  { %9944 = vmatpush3.bf16.msra.mxu1 %v11508_v20 }
 0x269   :  { %9946 = vmatprep.subr.bf16.mxu1 %v12699_v55 }
 0x26c   :  { %9948 = vmatpush3.bf16.msra.mxu1 %v12699_v55 }
 0x26d   :  { %9950 = vmatprep.subr.bf16.mxu1 %v12700_v48 }
 0x270   :  { %9952 = vmatpush3.bf16.msra.mxu1 %v12700_v48 }
 0x271   :  { %9954 = vmatprep.subr.bf16.mxu1 %v12701_v42 }
 0x274   :  { %9956 = vmatpush3.bf16.msra.mxu1 %v12701_v42 }
 0x275   :  { %9958 = vmatprep.subr.bf16.mxu1 %v12702_v6 }
 0x278   :  { %9960 = vmatpush3.bf16.msra.mxu1 %v12702_v6 }
 0x279   :  { %9962 = vmatprep.subr.bf16.mxu1 %v11208_v14 }
 0x27b   :  { %8498 = vmatmul.mubr.f32.vlgmr.msra.gmra.mrb[8].mxu1 %v11682_v59 }
 0x27c   :  { %9964 = vmatpush3.bf16.msra.mxu1 %v11208_v14  ;;  %8500 = vmatprep.mubr.f32.mxu1 %v11686_v31 }
 0x27d   :  { %9966 = vmatprep.subr.bf16.mxu1 %v11216_v18 }
 0x27f   :  { %8501 = vmatmul.mubr.f32.gmra.mrb[10].mxu1 %v11696_v39 }
 0x280   :  { %9968 = vmatpush3.bf16.msra.mxu1 %v11216_v18  ;;  %8535 = vmatprep.mubr.f32.mxu1 %v11647_v12  ;;  %v12703_v12 = vld [vmem:[#allocation25_spill] sm:$0xff] }
 0x281   :  { %9970 = vmatprep.subr.bf16.mxu1 %v11235_v28 }
 0x284   :  { %9972 = vmatpush3.bf16.msra.mxu1 %v11235_v28 }
 0x285   :  { %9974 = vmatprep.subr.bf16.mxu1 %v11249_v37 }
 0x288   :  { %9976 = vmatpush3.bf16.msra.mxu1 %v11249_v37 }
 0x289   :  { %9978 = vmatprep.subr.bf16.mxu1 %v11268_v47 }
 0x28c   :  { %9980 = vmatpush3.bf16.msra.mxu1 %v11268_v47 }
 0x28d   :  { %9982 = vmatprep.subr.bf16.mxu1 %v11289_v60 }
 0x290   :  { %9984 = vmatpush3.bf16.msra.mxu1 %v11289_v60 }
 0x291   :  { %9986 = vmatprep.subr.bf16.mxu1 %v11312_v8 }
 0x294   :  { %9988 = vmatpush3.bf16.msra.mxu1 %v11312_v8 }
 0x295   :  { %9990 = vmatprep.subr.bf16.mxu1 %v11329_v24 }
 0x298   :  { %9992 = vmatpush3.bf16.msra.mxu1 %v11329_v24 }
 0x29b   :  { %8536 = vmatmul.mubr.f32.vlgmr.msra.gmra.mrb[8].mxu1 %v11682_v59 }
 0x29c   :  { %8538 = vmatprep.mubr.f32.mxu1 %v11686_v31 }
 0x29f   :  { %8539 = vmatmul.mubr.f32.gmra.mrb[10].mxu1 %v11696_v39 }
 0x2a0   :  { %8549 = vmatprep.mubr.f32.mxu1 %v12703_v12 }
 0x2ae   :  { %v11830_v11 = vpop.f32.mrb[4].mxu1 }
 0x2af   :  { %12704 = vst [vmem:[#allocation30_spill] sm:$0xff] %v11830_v11  ;;  %v11832_v34 = vpop.f32.mrb[5].mxu1 }
 0x2b0   :  { %12705 = vst [vmem:[#allocation31_spill] sm:$0xff] %v11832_v34 }
 0x2b2   :  { %v11834_v36 = vpop.f32.mrb[6].mxu1 }
 0x2b3   :  { %12706 = vst [vmem:[#allocation32_spill] sm:$0xff] %v11834_v36  ;;  %v11836_v4 = vpop.f32.mrb[7].mxu1 }
 0x2b4   :  { %12707 = vst [vmem:[#allocation33_spill] sm:$0xff] %v11836_v4 }
 0x36e   :  { %v8537_v49 = vpop.f32.mrb[8].mxu1 }
 0x36f   :  { %v2272_v16 = vand.u32 4294901760, %v8537_v49  ;;  %v2246_v15 = vpop.f32.mrb[9].mxu1 }
 0x370   :  { %v2269_v29 = vand.u32 4294901760, %v2246_v15 }
 0x371   :  { %v2386_v27 = vsub.f32 %v8537_v49, %v2272_v16 }
 0x372   :  { %v11838_v59 = vpack.c.bf16 %v2272_v16, %v2269_v29  ;;  %v2379_v31 = vsub.f32 %v2246_v15, %v2269_v29  ;;  %v8540_v32 = vpop.f32.mrb[10].mxu1 }
 0x373   :  { %v2387_v39 = vand.u32 4294901760, %v2386_v27  ;;  %v2278_v58 = vand.u32 4294901760, %v8540_v32  ;;  %v2258_v62 = vpop.f32.mrb[11].mxu1 }
 0x374   :  { %v2380_v9 = vand.u32 4294901760, %v2379_v31  ;;  %v2275_v11 = vand.u32 4294901760, %v2258_v62  ;;  %9994 = vmatprep.subr.bf16.mxu1 %v11838_v59  ;;  %v10009_v34 = vpack.c.bf16 %v2386_v27, %v2379_v31 }
 0x375   :  { %v2388_v36 = vsub.f32 %v2386_v27, %v2387_v39  ;;  %v2400_v6 = vsub.f32 %v8540_v32, %v2278_v58  ;;  %9996 = vmatpush3.bf16.msra.mxu1 %v11838_v59 }
 0x376   :  { %v2381_v4 = vsub.f32 %v2379_v31, %v2380_v9  ;;  %v9997_v42 = vpack.c.bf16 %v2278_v58, %v2275_v11  ;;  %v2393_v48 = vsub.f32 %v2258_v62, %v2275_v11  ;;  %v10025_v49 = vpack.c.bf16 %v2387_v39, %v2380_v9  ;;  %v11887_v58 = vld [vmem:[#allocation2 + $0x8] sm:$0xff]  ;;  %v11899_v11 = vld [vmem:[#allocation2 + $0x18] sm:$0xff] }
 0x377   :  { %v2401_v16 = vand.u32 4294901760, %v2400_v6  ;;  %v2389_v55 = vand.u32 4294901760, %v2388_v36  ;;  %12709 = vst [vmem:[#allocation35_spill] sm:$0xff] %v11887_v58  ;;  %12711 = vst [vmem:[#allocation37_spill] sm:$0xff] %v11899_v11 }
 0x378   :  { %v2394_v15 = vand.u32 4294901760, %v2393_v48  ;;  %9998 = vmatprep.subr.bf16.mxu1 %v9997_v42  ;;  %v2382_v29 = vand.u32 4294901760, %v2381_v4  ;;  %v10013_v20 = vpack.c.bf16 %v2400_v6, %v2393_v48 }
 0x379   :  { %v2402_v19 = vsub.f32 %v2400_v6, %v2401_v16  ;;  %10000 = vmatpush3.bf16.msra.mxu1 %v9997_v42 }
 0x37a   :  { %v2395_v63 = vsub.f32 %v2393_v48, %v2394_v15  ;;  %v10001_v25 = vpack.c.bf16 %v2389_v55, %v2382_v29  ;;  %v10029_v45 = vpack.c.bf16 %v2401_v16, %v2394_v15  ;;  %v2895_v55 = vmul.f32 %v11887_v58, %v11887_v58  ;;  %v11892_v48 = vld [vmem:[#allocation2 + $0x10] sm:$0xff] }
 0x37b   :  { %v2403_v23 = vand.u32 4294901760, %v2402_v19  ;;  %12710 = vst [vmem:[#allocation36_spill] sm:$0xff] %v11892_v48 }
 0x37c   :  { %10002 = vmatprep.subr.bf16.mxu0 %v10001_v25  ;;  %v2396_v32 = vand.u32 4294901760, %v2395_v63  ;;  %8550 = vmatmul.mubr.f32.vlgmr.msra.gmra.mrb[12].mxu1 %v11616_v10  ;;  %v11897_v6 = vand.u32 4294901760, %v2895_v55 }
 0x37d   :  { %10004 = vmatpush3.bf16.msra.mxu0 %v10001_v25  ;;  %8552 = vmatprep.mubr.f32.mxu1 %v11622_v7 }
 0x37e   :  { %v10005_v9 = vpack.c.bf16 %v2403_v23, %v2396_v32  ;;  %v11856_v23 = vld [vmem:[#allocation2] sm:$0xff]  ;;  %v11908_v4 = vsub.f32 %v2895_v55, %v11897_v6  ;;  %v12713_v55 = vld [vmem:[#allocation16_spill] sm:$0xff] }
 0x37f   :  { %12708 = vst [vmem:[#allocation34_spill] sm:$0xff] %v11856_v23  ;;  %v2894_v25 = vmul.f32 %v11856_v23, %v11856_v23 }
 0x380   :  { %10006 = vmatprep.subr.bf16.mxu0 %v10005_v9  ;;  %8553 = vmatmul.mubr.f32.gmra.mrb[14].mxu1 %v11625_v57  ;;  %v2991_v31 = vand.u32 4294901760, %v11908_v4 }
 0x381   :  { %10008 = vmatpush3.bf16.msra.mxu0 %v10005_v9  ;;  %8861 = vmatprep.mubr.f32.mxu1 %v12703_v12  ;;  %v11862_v63 = vand.u32 4294901760, %v2894_v25 }
 0x382   :  { %10010 = vmatprep.subr.bf16.mxu0 %v10009_v34  ;;  %v2992_v16 = vsub.f32 %v11908_v4, %v2991_v31 }
 0x383   :  { %v11867_v19 = vsub.f32 %v2894_v25, %v11862_v63 }
 0x384   :  { %8564 = vmatmul.mubr.f32.vlgmr.msra.gmra.mrb[4].mxu0 %v11581_v46  ;;  %v2993_v32 = vand.u32 4294901760, %v2992_v16 }
 0x385   :  { %10012 = vmatpush3.bf16.msra.mxu0 %v10009_v34  ;;  %8566 = vmatprep.mubr.f32.mxu0 %v11583_v50  ;;  %v2897_v34 = vmul.f32 %v11899_v11, %v11899_v11 }
 0x386   :  { %10014 = vmatprep.subr.bf16.mxu0 %v10013_v20 }
 0x387   :  { %v11910_v27 = vand.u32 4294901760, %v2897_v34 }
 0x388   :  { %8567 = vmatmul.mubr.f32.gmra.mrb[6].mxu0 %v11589_v44 }
 0x389   :  { %10016 = vmatpush3.bf16.msra.mxu0 %v10013_v20  ;;  %8577 = vmatprep.mubr.f32.mxu0 %v11568_v2  ;;  %v2981_v20 = vand.u32 4294901760, %v11867_v19  ;;  %v11919_v39 = vsub.f32 %v2897_v34, %v11910_v27  ;;  %v12717_v34 = vld [vmem:[#allocation20_spill] sm:$0xff] }
 0x38a   :  { %10018 = vmatprep.subr.bf16.mxu0 %v11838_v59 }
 0x38b   :  { %v3011_v15 = vand.u32 4294901760, %v11919_v39 }
 0x38c   :  { %8578 = vmatmul.mubr.f32.vlgmr.msra.gmra.mrb[4].mxu0 %v11587_v54 }
 0x38d   :  { %10020 = vmatpush3.bf16.msra.mxu0 %v11838_v59  ;;  %8580 = vmatprep.mubr.f32.mxu0 %v11592_v17  ;;  %v3012_v9 = vsub.f32 %v11919_v39, %v3011_v15 }
 0x38e   :  { %10022 = vmatprep.subr.bf16.mxu0 %v9997_v42 }
 0x390   :  { %8581 = vmatmul.mubr.f32.gmra.mrb[6].mxu0 %v11598_v41 }
 0x391   :  { %10024 = vmatpush3.bf16.msra.mxu0 %v9997_v42  ;;  %8591 = vmatprep.mubr.f32.mxu0 %v11572_v3 }
 0x392   :  { %10026 = vmatprep.subr.bf16.mxu0 %v10025_v49 }
 0x394   :  { %8592 = vmatmul.mubr.f32.vlgmr.msra.gmra.mrb[4].mxu0 %v11595_v22 }
 0x395   :  { %10028 = vmatpush3.bf16.msra.mxu0 %v10025_v49  ;;  %8594 = vmatprep.mubr.f32.mxu0 %v11601_v61 }
 0x396   :  { %10030 = vmatprep.subr.bf16.mxu0 %v10029_v45 }
 0x398   :  { %8595 = vmatmul.mubr.f32.gmra.mrb[6].mxu0 %v11609_v35 }
 0x399   :  { %10032 = vmatpush3.bf16.msra.mxu0 %v10029_v45  ;;  %8605 = vmatprep.mubr.f32.mxu0 %v11565_v52  ;;  %v2982_v45 = vsub.f32 %v11867_v19, %v2981_v20 }
 0x39a   :  { %10034 = vmatprep.subr.bf16.mxu0 %v11838_v59 }
 0x39b   :  { %v2983_v62 = vand.u32 4294901760, %v2982_v45  ;;  %v3013_v45 = vand.u32 4294901760, %v3012_v9 }
 0x39c   :  { %8606 = vmatmul.mubr.f32.vlgmr.msra.gmra.mrb[4].mxu0 %v11581_v46 }
 0x39d   :  { %10036 = vmatpush3.bf16.msra.mxu0 %v11838_v59  ;;  %8608 = vmatprep.mubr.f32.mxu0 %v11583_v50 }
 0x39e   :  { %10038 = vmatprep.subr.bf16.mxu0 %v9997_v42 }
 0x3a0   :  { %8609 = vmatmul.mubr.f32.gmra.mrb[6].mxu0 %v11589_v44 }
 0x3a1   :  { %10040 = vmatpush3.bf16.msra.mxu0 %v9997_v42  ;;  %8619 = vmatprep.mubr.f32.mxu0 %v11565_v52  ;;  %v2896_v42 = vmul.f32 %v11892_v48, %v11892_v48 }
 0x3a2   :  { %10042 = vmatprep.subr.bf16.mxu0 %v11208_v14 }
 0x3a3   :  { %v11904_v36 = vand.u32 4294901760, %v2896_v42 }
 0x3a4   :  { %8620 = vmatmul.mubr.f32.vlgmr.msra.gmra.mrb[4].mxu0 %v11581_v46 }
 0x3a5   :  { %10044 = vmatpush3.bf16.msra.mxu0 %v11208_v14  ;;  %8622 = vmatprep.mubr.f32.mxu0 %v11583_v50  ;;  %v11914_v59 = vsub.f32 %v2896_v42, %v11904_v36  ;;  %v12716_v42 = vld [vmem:[#allocation19_spill] sm:$0xff] }
 0x3a6   :  { %10046 = vmatprep.subr.bf16.mxu0 %v11216_v18 }
 0x3a7   :  { %v3001_v49 = vand.u32 4294901760, %v11914_v59 }
 0x3a8   :  { %8623 = vmatmul.mubr.f32.gmra.mrb[6].mxu0 %v11589_v44 }
 0x3a9   :  { %10048 = vmatpush3.bf16.msra.mxu0 %v11216_v18  ;;  %8657 = vmatprep.mubr.f32.mxu0 %v2983_v62  ;;  %v3002_v29 = vsub.f32 %v11914_v59, %v3001_v49  ;;  %v12712_v62 = vld [vmem:[#allocation15_spill] sm:$0xff] }
 0x3aa   :  { %10050 = vmatprep.subr.bf16.mxu0 %v11235_v28 }
 0x3ab   :  { %v3003_v25 = vand.u32 4294901760, %v3002_v29 }
 0x3ad   :  { %10052 = vmatpush3.bf16.msra.mxu0 %v11235_v28 }
 0x3ae   :  { %10054 = vmatprep.subr.bf16.mxu0 %v11249_v37 }
 0x3b1   :  { %10056 = vmatpush3.bf16.msra.mxu0 %v11249_v37 }
 0x3b2   :  { %10058 = vmatprep.subr.bf16.mxu0 %v11268_v47 }
 0x3b5   :  { %10060 = vmatpush3.bf16.msra.mxu0 %v11268_v47 }
 0x3b6   :  { %10062 = vmatprep.subr.bf16.mxu0 %v11289_v60 }
 0x3b9   :  { %10064 = vmatpush3.bf16.msra.mxu0 %v11289_v60 }
 0x3ba   :  { %10066 = vmatprep.subr.bf16.mxu0 %v11312_v8 }
 0x3bd   :  { %10068 = vmatpush3.bf16.msra.mxu0 %v11312_v8 }
 0x3be   :  { %10070 = vmatprep.subr.bf16.mxu0 %v11329_v24 }
 0x3c1   :  { %10072 = vmatpush3.bf16.msra.mxu0 %v11329_v24 }
 0x3c2   :  { %10074 = vmatprep.subr.bf16.mxu0 %v11364_v56 }
 0x3c4   :  { %8658 = vmatmul.mubr.f32.vlgmr.msra.gmra.mrb[8].mxu0 %v2993_v32 }
 0x3c5   :  { %10076 = vmatpush3.bf16.msra.mxu0 %v11364_v56  ;;  %8660 = vmatprep.mubr.f32.mxu0 %v3003_v25 }
 0x3c6   :  { %10078 = vmatprep.subr.bf16.mxu0 %v11390_v43 }
 0x3c8   :  { %8661 = vmatmul.mubr.f32.gmra.mrb[10].mxu0 %v3013_v45  ;;  %v12722_v45 = vld [vmem:[#allocation30_spill] sm:$0xff] }
 0x3c9   :  { %10080 = vmatpush3.bf16.msra.mxu0 %v11390_v43  ;;  %8695 = vmatprep.mubr.f32.mxu0 %v11862_v63  ;;  %v12044_v11 = vmul.f32 %v12722_v45, %v12722_v45 }
 0x3ca   :  { %10082 = vmatprep.subr.bf16.mxu0 %v11407_v0 }
 0x3cb   :  { %12723 = vst [vmem:[#allocation15_spill] sm:$0xff] %v12044_v11 }
 0x3cd   :  { %10084 = vmatpush3.bf16.msra.mxu0 %v11407_v0 }
 0x3ce   :  { %10086 = vmatprep.subr.bf16.mxu0 %v11421_v53 }
 0x3d1   :  { %10088 = vmatpush3.bf16.msra.mxu0 %v11421_v53 }
 0x3d2   :  { %10090 = vmatprep.subr.bf16.mxu0 %v11432_v5 }
 0x3d5   :  { %10092 = vmatpush3.bf16.msra.mxu0 %v11432_v5 }
 0x3d6   :  { %10094 = vmatprep.subr.bf16.mxu0 %v11447_v38 }
 0x3d9   :  { %10096 = vmatpush3.bf16.msra.mxu0 %v11447_v38 }
 0x3da   :  { %10098 = vmatprep.subr.bf16.mxu0 %v11455_v33 }
 0x3dd   :  { %10100 = vmatpush3.bf16.msra.mxu0 %v11455_v33 }
 0x3de   :  { %10102 = vmatprep.subr.bf16.mxu0 %v11461_v13 }
 0x3e1   :  { %10104 = vmatpush3.bf16.msra.mxu0 %v11461_v13 }
 0x3e2   :  { %10106 = vmatprep.subr.bf16.mxu0 %v11224_v21 }
 0x3e4   :  { %8696 = vmatmul.mubr.f32.vlgmr.msra.gmra.mrb[8].mxu0 %v11897_v6 }
 0x3e5   :  { %10108 = vmatpush3.bf16.msra.mxu0 %v11224_v21  ;;  %8698 = vmatprep.mubr.f32.mxu0 %v11904_v36 }
 0x3e6   :  { %10110 = vmatprep.subr.bf16.mxu0 %v11231_v26 }
 0x3e8   :  { %8699 = vmatmul.mubr.f32.gmra.mrb[10].mxu0 %v11910_v27 }
 0x3e9   :  { %10112 = vmatpush3.bf16.msra.mxu0 %v11231_v26  ;;  %8733 = vmatprep.mubr.f32.mxu0 %v11867_v19  ;;  %v12714_v19 = vld [vmem:[#allocation17_spill] sm:$0xff] }
 0x3ea   :  { %10114 = vmatprep.subr.bf16.mxu0 %v11242_v30 }
 0x3ed   :  { %10116 = vmatpush3.bf16.msra.mxu0 %v11242_v30 }
 0x3ee   :  { %10118 = vmatprep.subr.bf16.mxu0 %v11258_v40 }
 0x3f1   :  { %10120 = vmatpush3.bf16.msra.mxu0 %v11258_v40 }
 0x3f2   :  { %10122 = vmatprep.subr.bf16.mxu0 %v11279_v51 }
 0x3f5   :  { %10124 = vmatpush3.bf16.msra.mxu0 %v11279_v51 }
 0x3f6   :  { %10126 = vmatprep.subr.bf16.mxu0 %v11298_v1 }
 0x3f9   :  { %10128 = vmatpush3.bf16.msra.mxu0 %v11298_v1 }
 0x3fa   :  { %10130 = vmatprep.subr.bf16.mxu0 %v12712_v62 }
 0x3fd   :  { %10132 = vmatpush3.bf16.msra.mxu0 %v12712_v62 }
 0x3fe   :  { %10134 = vmatprep.subr.bf16.mxu0 %v12713_v55 }
 0x401   :  { %10136 = vmatpush3.bf16.msra.mxu0 %v12713_v55 }
 0x402   :  { %10138 = vmatprep.subr.bf16.mxu0 %v11208_v14 }
 0x404   :  { %8734 = vmatmul.mubr.f32.vlgmr.msra.gmra.mrb[8].mxu0 %v11908_v4  ;;  %v12718_v4 = vld [vmem:[#allocation21_spill] sm:$0xff] }
 0x405   :  { %10140 = vmatpush3.bf16.msra.mxu0 %v11208_v14  ;;  %8736 = vmatprep.mubr.f32.mxu0 %v11914_v59  ;;  %v12719_v59 = vld [vmem:[#allocation22_spill] sm:$0xff] }
 0x406   :  { %10142 = vmatprep.subr.bf16.mxu0 %v11216_v18 }
 0x408   :  { %8737 = vmatmul.mubr.f32.gmra.mrb[10].mxu0 %v11919_v39  ;;  %v12721_v39 = vld [vmem:[#allocation24_spill] sm:$0xff] }
 0x409   :  { %10144 = vmatpush3.bf16.msra.mxu0 %v11216_v18  ;;  %8771 = vmatprep.mubr.f32.mxu0 %v2981_v20  ;;  %v12715_v20 = vld [vmem:[#allocation18_spill] sm:$0xff] }
 0x40a   :  { %10146 = vmatprep.subr.bf16.mxu0 %v11235_v28 }
 0x40d   :  { %10148 = vmatpush3.bf16.msra.mxu0 %v11235_v28 }
 0x40e   :  { %10150 = vmatprep.subr.bf16.mxu0 %v11249_v37 }
 0x411   :  { %10152 = vmatpush3.bf16.msra.mxu0 %v11249_v37 }
 0x412   :  { %10154 = vmatprep.subr.bf16.mxu0 %v11268_v47 }
 0x415   :  { %10156 = vmatpush3.bf16.msra.mxu0 %v11268_v47 }
 0x416   :  { %10158 = vmatprep.subr.bf16.mxu0 %v11289_v60 }
 0x419   :  { %10160 = vmatpush3.bf16.msra.mxu0 %v11289_v60 }
 0x41a   :  { %10162 = vmatprep.subr.bf16.mxu0 %v11312_v8 }
 0x41d   :  { %10164 = vmatpush3.bf16.msra.mxu0 %v11312_v8 }
 0x41e   :  { %10166 = vmatprep.subr.bf16.mxu0 %v11329_v24 }
 0x421   :  { %10168 = vmatpush3.bf16.msra.mxu0 %v11329_v24 }
 0x422   :  { %10170 = vmatprep.subr.bf16.mxu0 %v12714_v19 }
 0x424   :  { %8772 = vmatmul.mubr.f32.vlgmr.msra.gmra.mrb[8].mxu0 %v2991_v31  ;;  %v12720_v31 = vld [vmem:[#allocation23_spill] sm:$0xff] }
 0x425   :  { %10172 = vmatpush3.bf16.msra.mxu0 %v12714_v19  ;;  %8774 = vmatprep.mubr.f32.mxu0 %v3001_v49 }
 0x426   :  { %10174 = vmatprep.subr.bf16.mxu0 %v12715_v20 }
 0x428   :  { %8775 = vmatmul.mubr.f32.gmra.mrb[10].mxu0 %v3011_v15 }
 0x429   :  { %10176 = vmatpush3.bf16.msra.mxu0 %v12715_v20  ;;  %8809 = vmatprep.mubr.f32.mxu0 %v11862_v63 }
 0x42a   :  { %10178 = vmatprep.subr.bf16.mxu0 %v12716_v42 }
 0x42d   :  { %10180 = vmatpush3.bf16.msra.mxu0 %v12716_v42 }
 0x42e   :  { %10182 = vmatprep.subr.bf16.mxu0 %v12717_v34 }
 0x431   :  { %10184 = vmatpush3.bf16.msra.mxu0 %v12717_v34 }
 0x432   :  { %10186 = vmatprep.subr.bf16.mxu0 %v12718_v4 }
 0x435   :  { %10188 = vmatpush3.bf16.msra.mxu0 %v12718_v4 }
 0x436   :  { %10190 = vmatprep.subr.bf16.mxu0 %v12719_v59 }
 0x439   :  { %10192 = vmatpush3.bf16.msra.mxu0 %v12719_v59 }
 0x43a   :  { %10194 = vmatprep.subr.bf16.mxu0 %v12720_v31 }
 0x43d   :  { %10196 = vmatpush3.bf16.msra.mxu0 %v12720_v31 }
 0x43e   :  { %10198 = vmatprep.subr.bf16.mxu0 %v12721_v39 }
 0x441   :  { %10200 = vmatpush3.bf16.msra.mxu0 %v12721_v39 }
 0x442   :  { %10202 = vmatprep.subr.bf16.mxu0 %v11208_v14 }
 0x444   :  { %8810 = vmatmul.mubr.f32.vlgmr.msra.gmra.mrb[8].mxu0 %v11897_v6 }
 0x445   :  { %10204 = vmatpush3.bf16.msra.mxu0 %v11208_v14  ;;  %8812 = vmatprep.mubr.f32.mxu0 %v11904_v36 }
 0x446   :  { %10206 = vmatprep.subr.bf16.mxu0 %v11216_v18 }
 0x448   :  { %8813 = vmatmul.mubr.f32.gmra.mrb[10].mxu0 %v11910_v27 }
 0x449   :  { %10208 = vmatpush3.bf16.msra.mxu0 %v11216_v18  ;;  %8847 = vmatprep.mubr.f32.mxu0 %v11862_v63 }
 0x44a   :  { %10210 = vmatprep.subr.bf16.mxu0 %v11235_v28 }
 0x44d   :  { %10212 = vmatpush3.bf16.msra.mxu0 %v11235_v28 }
 0x44e   :  { %10214 = vmatprep.subr.bf16.mxu0 %v11249_v37 }
 0x44f   :  { %v8551_v49 = vpop.f32.mrb[12].mxu1 }
 0x450   :  { %v2343_v16 = vpop.f32.mrb[13].mxu1 }
 0x451   :  { %10216 = vmatpush3.bf16.msra.mxu0 %v11249_v37 }
 0x452   :  { %10218 = vmatprep.subr.bf16.mxu0 %v11268_v47 }
 0x453   :  { %v8554_v15 = vpop.f32.mrb[14].mxu1 }
 0x454   :  { %v2363_v29 = vpop.f32.mrb[15].mxu1 }
 0x455   :  { %10220 = vmatpush3.bf16.msra.mxu0 %v11268_v47 }
 0x456   :  { %10222 = vmatprep.subr.bf16.mxu0 %v11289_v60 }
 0x459   :  { %10224 = vmatpush3.bf16.msra.mxu0 %v11289_v60 }
 0x45a   :  { %10226 = vmatprep.subr.bf16.mxu0 %v11312_v8 }
 0x45d   :  { %10228 = vmatpush3.bf16.msra.mxu0 %v11312_v8 }
 0x45e   :  { %10230 = vmatprep.subr.bf16.mxu0 %v11329_v24 }
 0x461   :  { %10232 = vmatpush3.bf16.msra.mxu0 %v11329_v24 }
 0x464   :  { %8848 = vmatmul.mubr.f32.vlgmr.msra.gmra.mrb[8].mxu0 %v11897_v6  ;;  %v12726_v6 = vld [vmem:[#allocation31_spill] sm:$0xff] }
 0x465   :  { %8850 = vmatprep.mubr.f32.mxu0 %v11904_v36  ;;  %v12053_v36 = vmul.f32 %v12726_v6, %v12726_v6 }
 0x467   :  { %12727 = vst [vmem:[#allocation31_spill] sm:$0xff] %v12053_v36 }
 0x468   :  { %8851 = vmatmul.mubr.f32.gmra.mrb[10].mxu0 %v11910_v27 }
 0x469   :  { %9173 = vmatprep.mubr.f32.mxu0 %v12703_v12 }
 0x477   :  { %v8621_v63 = vpop.f32.mrb[4].mxu0 }
 0x478   :  { %v10765_v32 = vadd.f32 %v8621_v63, %v8551_v49  ;;  %v2860_v9 = vpop.f32.mrb[5].mxu0 }
 0x479   :  { %v10766_v25 = vadd.f32 %v2860_v9, %v2343_v16 }
 0x47a   :  { %v12046_v48 = vmul.f32 %v10765_v32, %v10765_v32  ;;  %v12049_v58 = vmul.f32 %v10765_v32, %v12722_v45  ;;  %v12732_v45 = vld [vmem:[#allocation32_spill] sm:$0xff] }
 0x47b   :  { %v8624_v27 = vpop.f32.mrb[6].mxu0  ;;  %v12055_v23 = vmul.f32 %v10766_v25, %v10766_v25  ;;  %v12058_v49 = vmul.f32 %v10766_v25, %v12726_v6 }
 0x47c   :  { %12724 = vst [vmem:[#allocation30_spill] sm:$0xff] %v12046_v48  ;;  %12725 = vst [vmem:[#allocation38_spill] sm:$0xff] %v12049_v58  ;;  %v10767_v16 = vadd.f32 %v8624_v27, %v8554_v15  ;;  %v2872_v63 = vpop.f32.mrb[7].mxu0  ;;  %v12062_v9 = vadd.f32 %v12046_v48, %v12044_v11  ;;  %v12070_v58 = vmul.f32 %v12732_v45, %v12732_v45  ;;  %v12736_v15 = vld [vmem:[#allocation33_spill] sm:$0xff] }
 0x47d   :  { %12728 = vst [vmem:[#allocation39_spill] sm:$0xff] %v12055_v23  ;;  %12729 = vst [vmem:[#allocation40_spill] sm:$0xff] %v12058_v49  ;;  %v10768_v12 = vadd.f32 %v2872_v63, %v2363_v29  ;;  %v12066_v32 = vadd.f32 %v12055_v23, %v12053_v36  ;;  %v12079_v6 = vmul.f32 %v12736_v15, %v12736_v15 }
 0x47e   :  { %12730 = vst [vmem:[#allocation41_spill] sm:$0xff] %v12062_v9  ;;  %12733 = vst [vmem:[#allocation32_spill] sm:$0xff] %v12070_v58  ;;  %v12072_v39 = vmul.f32 %v10767_v16, %v10767_v16  ;;  %v12075_v25 = vmul.f32 %v10767_v16, %v12732_v45 }
 0x47f   :  { %12731 = vst [vmem:[#allocation42_spill] sm:$0xff] %v12066_v32  ;;  %12737 = vst [vmem:[#allocation33_spill] sm:$0xff] %v12079_v6  ;;  %v12081_v27 = vmul.f32 %v10768_v12, %v10768_v12  ;;  %v12084_v29 = vmul.f32 %v10768_v12, %v12736_v15 }
 0x480   :  { %12734 = vst [vmem:[#allocation43_spill] sm:$0xff] %v12072_v39  ;;  %12735 = vst [vmem:[#allocation44_spill] sm:$0xff] %v12075_v25  ;;  %v12088_v63 = vadd.f32 %v12072_v39, %v12070_v58 }
 0x481   :  { %12738 = vst [vmem:[#allocation45_spill] sm:$0xff] %v12081_v27  ;;  %12739 = vst [vmem:[#allocation46_spill] sm:$0xff] %v12084_v29  ;;  %v12092_v49 = vadd.f32 %v12081_v27, %v12079_v6 }
 0x482   :  { %12740 = vst [vmem:[#allocation47_spill] sm:$0xff] %v12088_v63 }
 0x483   :  { %12741 = vst [vmem:[#allocation48_spill] sm:$0xff] %v12092_v49 }
 0x537   :  { %v8849_v32 = vpop.f32.mrb[8].mxu0 }
 0x538   :  { %v3672_v16 = vand.u32 4294901760, %v8849_v32  ;;  %v3646_v45 = vpop.f32.mrb[9].mxu0 }
 0x539   :  { %v3669_v25 = vand.u32 4294901760, %v3646_v45 }
 0x53a   :  { %v3786_v9 = vsub.f32 %v8849_v32, %v3672_v16 }
 0x53b   :  { %v12094_v23 = vpack.c.bf16 %v3672_v16, %v3669_v25  ;;  %v3779_v48 = vsub.f32 %v3646_v45, %v3669_v25  ;;  %v8852_v36 = vpop.f32.mrb[10].mxu0 }
 0x53c   :  { %v3787_v11 = vand.u32 4294901760, %v3786_v9  ;;  %v3678_v12 = vand.u32 4294901760, %v8852_v36  ;;  %v3658_v15 = vpop.f32.mrb[11].mxu0 }
 0x53d   :  { %v3780_v29 = vand.u32 4294901760, %v3779_v48  ;;  %v3675_v31 = vand.u32 4294901760, %v3658_v15  ;;  %10234 = vmatprep.subr.bf16.mxu1 %v12094_v23  ;;  %v10249_v63 = vpack.c.bf16 %v3786_v9, %v3779_v48 }
 0x53e   :  { %v3788_v39 = vsub.f32 %v3786_v9, %v3787_v11  ;;  %v3800_v27 = vsub.f32 %v8852_v36, %v3678_v12  ;;  %10236 = vmatpush3.bf16.msra.mxu1 %v12094_v23 }
 0x53f   :  { %v3781_v49 = vsub.f32 %v3779_v48, %v3780_v29  ;;  %v10237_v6 = vpack.c.bf16 %v3678_v12, %v3675_v31  ;;  %v3793_v58 = vsub.f32 %v3658_v15, %v3675_v31  ;;  %v10265_v32 = vpack.c.bf16 %v3787_v11, %v3780_v29 }
 0x540   :  { %v3801_v16 = vand.u32 4294901760, %v3800_v27  ;;  %v3789_v59 = vand.u32 4294901760, %v3788_v39 }
 0x541   :  { %v3794_v25 = vand.u32 4294901760, %v3793_v58  ;;  %10238 = vmatprep.subr.bf16.mxu1 %v10237_v6  ;;  %v3782_v45 = vand.u32 4294901760, %v3781_v49  ;;  %v10253_v4 = vpack.c.bf16 %v3800_v27, %v3793_v58  ;;  %v12745_v49 = vld [vmem:[#allocation29_spill] sm:$0xff] }
 0x542   :  { %v3802_v34 = vsub.f32 %v3800_v27, %v3801_v16  ;;  %10240 = vmatpush3.bf16.msra.mxu1 %v10237_v6  ;;  %v4289_v9 = vmul.f32 %v12745_v49, %v12745_v49  ;;  %v12754_v49 = vld [vmem:[#allocation24_spill] sm:$0xff] }
 0x543   :  { %v3795_v42 = vsub.f32 %v3793_v58, %v3794_v25  ;;  %v10241_v20 = vpack.c.bf16 %v3789_v59, %v3782_v45  ;;  %v10269_v19 = vpack.c.bf16 %v3801_v16, %v3794_v25  ;;  %v12742_v58 = vld [vmem:[#allocation26_spill] sm:$0xff]  ;;  %v12744_v59 = vld [vmem:[#allocation28_spill] sm:$0xff] }
 0x544   :  { %v3803_v55 = vand.u32 4294901760, %v3802_v34  ;;  %v4286_v11 = vmul.f32 %v12742_v58, %v12742_v58  ;;  %v12743_v34 = vld [vmem:[#allocation27_spill] sm:$0xff]  ;;  %v4288_v31 = vmul.f32 %v12744_v59, %v12744_v59  ;;  %v12158_v29 = vand.u32 4294901760, %v4289_v9  ;;  %v12752_v59 = vld [vmem:[#allocation22_spill] sm:$0xff] }
 0x545   :  { %8862 = vmatmul.mubr.f32.vlgmr.msra.gmra.mrb[16].mxu1 %v11616_v10  ;;  %10242 = vmatprep.subr.bf16.mxu1 %v10241_v20  ;;  %v3796_v36 = vand.u32 4294901760, %v3795_v42 }
 0x546   :  { %10244 = vmatpush3.bf16.msra.mxu1 %v10241_v20  ;;  %8864 = vmatprep.mubr.f32.mxu1 %v11622_v7  ;;  %v12167_v15 = vsub.f32 %v4289_v9, %v12158_v29 }
 0x547   :  { %v10245_v48 = vpack.c.bf16 %v3803_v55, %v3796_v36  ;;  %v12116_v55 = vand.u32 4294901760, %v4286_v11 }
 0x548   :  { %v4403_v25 = vand.u32 4294901760, %v12167_v15 }
 0x549   :  { %8865 = vmatmul.mubr.f32.gmra.mrb[18].mxu1 %v11625_v57  ;;  %10246 = vmatprep.subr.bf16.mxu1 %v10245_v48  ;;  %v12121_v20 = vsub.f32 %v4286_v11, %v12116_v55 }
 0x54a   :  { %10248 = vmatpush3.bf16.msra.mxu1 %v10245_v48  ;;  %8875 = vmatprep.mubr.f32.mxu1 %v11565_v52  ;;  %v4404_v48 = vsub.f32 %v12167_v15, %v4403_v25 }
 0x54b   :  { %10250 = vmatprep.subr.bf16.mxu1 %v10249_v63  ;;  %v4373_v42 = vand.u32 4294901760, %v12121_v20 }
 0x54c   :  { %v4405_v11 = vand.u32 4294901760, %v4404_v48 }
 0x54d   :  { %8876 = vmatmul.mubr.f32.vlgmr.msra.gmra.mrb[16].mxu1 %v11581_v46 }
 0x54e   :  { %10252 = vmatpush3.bf16.msra.mxu1 %v10249_v63  ;;  %8878 = vmatprep.mubr.f32.mxu1 %v11583_v50 }
 0x54f   :  { %10254 = vmatprep.subr.bf16.mxu1 %v10253_v4 }
 0x551   :  { %8879 = vmatmul.mubr.f32.gmra.mrb[18].mxu1 %v11589_v44 }
 0x552   :  { %10256 = vmatpush3.bf16.msra.mxu1 %v10253_v4  ;;  %8889 = vmatprep.mubr.f32.mxu1 %v11568_v2  ;;  %v4287_v4 = vmul.f32 %v12743_v34, %v12743_v34  ;;  %v12750_v34 = vld [vmem:[#allocation20_spill] sm:$0xff] }
 0x553   :  { %10258 = vmatprep.subr.bf16.mxu1 %v12094_v23 }
 0x554   :  { %v12147_v39 = vand.u32 4294901760, %v4287_v4 }
 0x555   :  { %8890 = vmatmul.mubr.f32.vlgmr.msra.gmra.mrb[16].mxu1 %v11587_v54 }
 0x556   :  { %10260 = vmatpush3.bf16.msra.mxu1 %v12094_v23  ;;  %8892 = vmatprep.mubr.f32.mxu1 %v11592_v17  ;;  %v12156_v27 = vsub.f32 %v4287_v4, %v12147_v39  ;;  %v12751_v4 = vld [vmem:[#allocation21_spill] sm:$0xff] }
 0x557   :  { %10262 = vmatprep.subr.bf16.mxu1 %v10237_v6 }
 0x558   :  { %v4383_v12 = vand.u32 4294901760, %v12156_v27 }
 0x559   :  { %8893 = vmatmul.mubr.f32.gmra.mrb[18].mxu1 %v11598_v41 }
 0x55a   :  { %10264 = vmatpush3.bf16.msra.mxu1 %v10237_v6  ;;  %8903 = vmatprep.mubr.f32.mxu1 %v11572_v3  ;;  %v4384_v16 = vsub.f32 %v12156_v27, %v4383_v12 }
 0x55b   :  { %10266 = vmatprep.subr.bf16.mxu1 %v10265_v32 }
 0x55c   :  { %v4385_v36 = vand.u32 4294901760, %v4384_v16 }
 0x55d   :  { %8904 = vmatmul.mubr.f32.vlgmr.msra.gmra.mrb[16].mxu1 %v11595_v22 }
 0x55e   :  { %10268 = vmatpush3.bf16.msra.mxu1 %v10265_v32  ;;  %8906 = vmatprep.mubr.f32.mxu1 %v11601_v61 }
 0x55f   :  { %10270 = vmatprep.subr.bf16.mxu1 %v10269_v19 }
 0x561   :  { %8907 = vmatmul.mubr.f32.gmra.mrb[18].mxu1 %v11609_v35 }
 0x562   :  { %10272 = vmatpush3.bf16.msra.mxu1 %v10269_v19  ;;  %8917 = vmatprep.mubr.f32.mxu1 %v11565_v52  ;;  %v4374_v19 = vsub.f32 %v12121_v20, %v4373_v42 }
 0x563   :  { %10274 = vmatprep.subr.bf16.mxu1 %v12094_v23 }
 0x565   :  { %8918 = vmatmul.mubr.f32.vlgmr.msra.gmra.mrb[16].mxu1 %v11581_v46 }
 0x566   :  { %10276 = vmatpush3.bf16.msra.mxu1 %v12094_v23  ;;  %8920 = vmatprep.mubr.f32.mxu1 %v11583_v50  ;;  %v4375_v23 = vand.u32 4294901760, %v4374_v19  ;;  %v12746_v19 = vld [vmem:[#allocation16_spill] sm:$0xff] }
 0x567   :  { %10278 = vmatprep.subr.bf16.mxu1 %v10237_v6 }
 0x569   :  { %8921 = vmatmul.mubr.f32.gmra.mrb[18].mxu1 %v11589_v44 }
 0x56a   :  { %10280 = vmatpush3.bf16.msra.mxu1 %v10237_v6  ;;  %8931 = vmatprep.mubr.f32.mxu1 %v11565_v52  ;;  %v12152_v6 = vand.u32 4294901760, %v4288_v31 }
 0x56b   :  { %10282 = vmatprep.subr.bf16.mxu1 %v11208_v14 }
 0x56c   :  { %v12162_v63 = vsub.f32 %v4288_v31, %v12152_v6  ;;  %v12753_v31 = vld [vmem:[#allocation23_spill] sm:$0xff] }
 0x56d   :  { %8932 = vmatmul.mubr.f32.vlgmr.msra.gmra.mrb[16].mxu1 %v11581_v46 }
 0x56e   :  { %10284 = vmatpush3.bf16.msra.mxu1 %v11208_v14  ;;  %8934 = vmatprep.mubr.f32.mxu1 %v11583_v50  ;;  %v4393_v32 = vand.u32 4294901760, %v12162_v63 }
 0x56f   :  { %10286 = vmatprep.subr.bf16.mxu1 %v11216_v18 }
 0x570   :  { %v4394_v45 = vsub.f32 %v12162_v63, %v4393_v32 }
 0x571   :  { %8935 = vmatmul.mubr.f32.gmra.mrb[18].mxu1 %v11589_v44 }
 0x572   :  { %10288 = vmatpush3.bf16.msra.mxu1 %v11216_v18  ;;  %8969 = vmatprep.mubr.f32.mxu1 %v4375_v23  ;;  %v4395_v58 = vand.u32 4294901760, %v4394_v45  ;;  %v12749_v23 = vld [vmem:[#allocation19_spill] sm:$0xff] }
 0x573   :  { %10290 = vmatprep.subr.bf16.mxu1 %v11235_v28 }
 0x576   :  { %10292 = vmatpush3.bf16.msra.mxu1 %v11235_v28 }
 0x577   :  { %10294 = vmatprep.subr.bf16.mxu1 %v11249_v37 }
 0x57a   :  { %10296 = vmatpush3.bf16.msra.mxu1 %v11249_v37 }
 0x57b   :  { %10298 = vmatprep.subr.bf16.mxu1 %v11268_v47 }
 0x57e   :  { %10300 = vmatpush3.bf16.msra.mxu1 %v11268_v47 }
 0x57f   :  { %10302 = vmatprep.subr.bf16.mxu1 %v11289_v60 }
 0x582   :  { %10304 = vmatpush3.bf16.msra.mxu1 %v11289_v60 }
 0x583   :  { %10306 = vmatprep.subr.bf16.mxu1 %v11312_v8 }
 0x586   :  { %10308 = vmatpush3.bf16.msra.mxu1 %v11312_v8 }
 0x587   :  { %10310 = vmatprep.subr.bf16.mxu1 %v11329_v24 }
 0x58a   :  { %10312 = vmatpush3.bf16.msra.mxu1 %v11329_v24 }
 0x58b   :  { %10314 = vmatprep.subr.bf16.mxu1 %v11364_v56 }
 0x58d   :  { %8970 = vmatmul.mubr.f32.vlgmr.msra.gmra.mrb[20].mxu1 %v4385_v36 }
 0x58e   :  { %10316 = vmatpush3.bf16.msra.mxu1 %v11364_v56  ;;  %8972 = vmatprep.mubr.f32.mxu1 %v4395_v58 }
 0x58f   :  { %10318 = vmatprep.subr.bf16.mxu1 %v11390_v43 }
 0x591   :  { %8973 = vmatmul.mubr.f32.gmra.mrb[22].mxu1 %v4405_v11 }
 0x592   :  { %10320 = vmatpush3.bf16.msra.mxu1 %v11390_v43  ;;  %9007 = vmatprep.mubr.f32.mxu1 %v12116_v55 }
 0x593   :  { %10322 = vmatprep.subr.bf16.mxu1 %v11407_v0 }
 0x596   :  { %10324 = vmatpush3.bf16.msra.mxu1 %v11407_v0 }
 0x597   :  { %10326 = vmatprep.subr.bf16.mxu1 %v11421_v53 }
 0x59a   :  { %10328 = vmatpush3.bf16.msra.mxu1 %v11421_v53 }
 0x59b   :  { %10330 = vmatprep.subr.bf16.mxu1 %v11432_v5 }
 0x59e   :  { %10332 = vmatpush3.bf16.msra.mxu1 %v11432_v5 }
 0x59f   :  { %10334 = vmatprep.subr.bf16.mxu1 %v11447_v38 }
 0x5a2   :  { %10336 = vmatpush3.bf16.msra.mxu1 %v11447_v38 }
 0x5a3   :  { %10338 = vmatprep.subr.bf16.mxu1 %v11455_v33 }
 0x5a6   :  { %10340 = vmatpush3.bf16.msra.mxu1 %v11455_v33 }
 0x5a7   :  { %10342 = vmatprep.subr.bf16.mxu1 %v11461_v13 }
 0x5aa   :  { %10344 = vmatpush3.bf16.msra.mxu1 %v11461_v13 }
 0x5ab   :  { %10346 = vmatprep.subr.bf16.mxu1 %v11224_v21 }
 0x5ad   :  { %9008 = vmatmul.mubr.f32.vlgmr.msra.gmra.mrb[20].mxu1 %v12147_v39 }
 0x5ae   :  { %10348 = vmatpush3.bf16.msra.mxu1 %v11224_v21  ;;  %9010 = vmatprep.mubr.f32.mxu1 %v12152_v6 }
 0x5af   :  { %10350 = vmatprep.subr.bf16.mxu1 %v11231_v26 }
 0x5b1   :  { %9011 = vmatmul.mubr.f32.gmra.mrb[22].mxu1 %v12158_v29 }
 0x5b2   :  { %10352 = vmatpush3.bf16.msra.mxu1 %v11231_v26  ;;  %9045 = vmatprep.mubr.f32.mxu1 %v12121_v20  ;;  %v12747_v20 = vld [vmem:[#allocation17_spill] sm:$0xff] }
 0x5b3   :  { %10354 = vmatprep.subr.bf16.mxu1 %v11242_v30 }
 0x5b6   :  { %10356 = vmatpush3.bf16.msra.mxu1 %v11242_v30 }
 0x5b7   :  { %10358 = vmatprep.subr.bf16.mxu1 %v11258_v40 }
 0x5ba   :  { %10360 = vmatpush3.bf16.msra.mxu1 %v11258_v40 }
 0x5bb   :  { %10362 = vmatprep.subr.bf16.mxu1 %v11279_v51 }
 0x5be   :  { %10364 = vmatpush3.bf16.msra.mxu1 %v11279_v51 }
 0x5bf   :  { %10366 = vmatprep.subr.bf16.mxu1 %v11298_v1 }
 0x5c2   :  { %10368 = vmatpush3.bf16.msra.mxu1 %v11298_v1 }
 0x5c3   :  { %10370 = vmatprep.subr.bf16.mxu1 %v12712_v62 }
 0x5c6   :  { %10372 = vmatpush3.bf16.msra.mxu1 %v12712_v62 }
 0x5c7   :  { %10374 = vmatprep.subr.bf16.mxu1 %v12746_v19 }
 0x5ca   :  { %10376 = vmatpush3.bf16.msra.mxu1 %v12746_v19 }
 0x5cb   :  { %10378 = vmatprep.subr.bf16.mxu1 %v11208_v14 }
 0x5cd   :  { %9046 = vmatmul.mubr.f32.vlgmr.msra.gmra.mrb[20].mxu1 %v12156_v27 }
 0x5ce   :  { %10380 = vmatpush3.bf16.msra.mxu1 %v11208_v14  ;;  %9048 = vmatprep.mubr.f32.mxu1 %v12162_v63 }
 0x5cf   :  { %10382 = vmatprep.subr.bf16.mxu1 %v11216_v18 }
 0x5d1   :  { %9049 = vmatmul.mubr.f32.gmra.mrb[22].mxu1 %v12167_v15 }
 0x5d2   :  { %10384 = vmatpush3.bf16.msra.mxu1 %v11216_v18  ;;  %9083 = vmatprep.mubr.f32.mxu1 %v4373_v42  ;;  %v12748_v42 = vld [vmem:[#allocation18_spill] sm:$0xff] }
 0x5d3   :  { %10386 = vmatprep.subr.bf16.mxu1 %v11235_v28 }
 0x5d6   :  { %10388 = vmatpush3.bf16.msra.mxu1 %v11235_v28 }
 0x5d7   :  { %10390 = vmatprep.subr.bf16.mxu1 %v11249_v37 }
 0x5da   :  { %10392 = vmatpush3.bf16.msra.mxu1 %v11249_v37 }
 0x5db   :  { %10394 = vmatprep.subr.bf16.mxu1 %v11268_v47 }
 0x5de   :  { %10396 = vmatpush3.bf16.msra.mxu1 %v11268_v47 }
 0x5df   :  { %10398 = vmatprep.subr.bf16.mxu1 %v11289_v60 }
 0x5e2   :  { %10400 = vmatpush3.bf16.msra.mxu1 %v11289_v60 }
 0x5e3   :  { %10402 = vmatprep.subr.bf16.mxu1 %v11312_v8 }
 0x5e6   :  { %10404 = vmatpush3.bf16.msra.mxu1 %v11312_v8 }
 0x5e7   :  { %10406 = vmatprep.subr.bf16.mxu1 %v11329_v24 }
 0x5ea   :  { %10408 = vmatpush3.bf16.msra.mxu1 %v11329_v24 }
 0x5eb   :  { %10410 = vmatprep.subr.bf16.mxu1 %v12747_v20 }
 0x5ed   :  { %9084 = vmatmul.mubr.f32.vlgmr.msra.gmra.mrb[20].mxu1 %v4383_v12 }
 0x5ee   :  { %10412 = vmatpush3.bf16.msra.mxu1 %v12747_v20  ;;  %9086 = vmatprep.mubr.f32.mxu1 %v4393_v32 }
 0x5ef   :  { %10414 = vmatprep.subr.bf16.mxu1 %v12748_v42 }
 0x5f1   :  { %9087 = vmatmul.mubr.f32.gmra.mrb[22].mxu1 %v4403_v25 }
 0x5f2   :  { %10416 = vmatpush3.bf16.msra.mxu1 %v12748_v42  ;;  %9121 = vmatprep.mubr.f32.mxu1 %v12116_v55 }
 0x5f3   :  { %10418 = vmatprep.subr.bf16.mxu1 %v12749_v23 }
 0x5f6   :  { %10420 = vmatpush3.bf16.msra.mxu1 %v12749_v23 }
 0x5f7   :  { %10422 = vmatprep.subr.bf16.mxu1 %v12750_v34 }
 0x5fa   :  { %10424 = vmatpush3.bf16.msra.mxu1 %v12750_v34 }
 0x5fb   :  { %10426 = vmatprep.subr.bf16.mxu1 %v12751_v4 }
 0x5fe   :  { %10428 = vmatpush3.bf16.msra.mxu1 %v12751_v4 }
 0x5ff   :  { %10430 = vmatprep.subr.bf16.mxu1 %v12752_v59 }
 0x602   :  { %10432 = vmatpush3.bf16.msra.mxu1 %v12752_v59 }
 0x603   :  { %10434 = vmatprep.subr.bf16.mxu1 %v12753_v31 }
 0x606   :  { %10436 = vmatpush3.bf16.msra.mxu1 %v12753_v31 }
 0x607   :  { %10438 = vmatprep.subr.bf16.mxu1 %v12754_v49 }
 0x60a   :  { %10440 = vmatpush3.bf16.msra.mxu1 %v12754_v49 }
 0x60b   :  { %10442 = vmatprep.subr.bf16.mxu1 %v11208_v14 }
 0x60d   :  { %9122 = vmatmul.mubr.f32.vlgmr.msra.gmra.mrb[20].mxu1 %v12147_v39 }
 0x60e   :  { %10444 = vmatpush3.bf16.msra.mxu1 %v11208_v14  ;;  %9124 = vmatprep.mubr.f32.mxu1 %v12152_v6 }
 0x60f   :  { %10446 = vmatprep.subr.bf16.mxu1 %v11216_v18 }
 0x611   :  { %9125 = vmatmul.mubr.f32.gmra.mrb[22].mxu1 %v12158_v29 }
 0x612   :  { %10448 = vmatpush3.bf16.msra.mxu1 %v11216_v18  ;;  %9159 = vmatprep.mubr.f32.mxu1 %v12116_v55  ;;  %v12755_v55 = vld [vmem:[#allocation25_spill] sm:$0xff] }
 0x613   :  { %10450 = vmatprep.subr.bf16.mxu1 %v11235_v28 }
 0x616   :  { %10452 = vmatpush3.bf16.msra.mxu1 %v11235_v28 }
 0x617   :  { %10454 = vmatprep.subr.bf16.mxu1 %v11249_v37 }
 0x61a   :  { %10456 = vmatpush3.bf16.msra.mxu1 %v11249_v37 }
 0x61b   :  { %10458 = vmatprep.subr.bf16.mxu1 %v11268_v47 }
 0x61e   :  { %10460 = vmatpush3.bf16.msra.mxu1 %v11268_v47 }
 0x61f   :  { %10462 = vmatprep.subr.bf16.mxu1 %v11289_v60 }
 0x622   :  { %10464 = vmatpush3.bf16.msra.mxu1 %v11289_v60 }
 0x623   :  { %10466 = vmatprep.subr.bf16.mxu1 %v11312_v8 }
 0x626   :  { %10468 = vmatpush3.bf16.msra.mxu1 %v11312_v8 }
 0x627   :  { %10470 = vmatprep.subr.bf16.mxu1 %v11329_v24 }
 0x62a   :  { %10472 = vmatpush3.bf16.msra.mxu1 %v11329_v24 }
 0x62d   :  { %9160 = vmatmul.mubr.f32.vlgmr.msra.gmra.mrb[20].mxu1 %v12147_v39 }
 0x62e   :  { %9162 = vmatprep.mubr.f32.mxu1 %v12152_v6 }
 0x631   :  { %9163 = vmatmul.mubr.f32.gmra.mrb[22].mxu1 %v12158_v29 }
 0x632   :  { %9485 = vmatprep.mubr.f32.mxu1 %v12755_v55 }
 0x640   :  { %v12290_v9 = vpop.f32.mrb[16].mxu1 }
 0x641   :  { %12756 = vst [vmem:[#allocation26_spill] sm:$0xff] %v12290_v9  ;;  %v12294_v12 = vpop.f32.mrb[17].mxu1 }
 0x642   :  { %12758 = vst [vmem:[#allocation27_spill] sm:$0xff] %v12294_v12 }
 0x644   :  { %v12298_v16 = vpop.f32.mrb[18].mxu1 }
 0x645   :  { %12760 = vst [vmem:[#allocation28_spill] sm:$0xff] %v12298_v16  ;;  %v12302_v6 = vpop.f32.mrb[19].mxu1 }
 0x646   :  { %12762 = vst [vmem:[#allocation29_spill] sm:$0xff] %v12302_v6 }
 0x700   :  { %v9161_v36 = vpop.f32.mrb[20].mxu1 }
 0x701   :  { %v5064_v48 = vand.u32 4294901760, %v9161_v36  ;;  %v5038_v58 = vpop.f32.mrb[21].mxu1 }
 0x702   :  { %v5061_v11 = vand.u32 4294901760, %v5038_v58 }
 0x703   :  { %v5178_v55 = vsub.f32 %v9161_v36, %v5064_v48 }
 0x704   :  { %v12306_v63 = vpack.c.bf16 %v5064_v48, %v5061_v11  ;;  %v5171_v27 = vsub.f32 %v5038_v58, %v5061_v11  ;;  %v9164_v9 = vpop.f32.mrb[22].mxu1 }
 0x705   :  { %v5179_v32 = vand.u32 4294901760, %v5178_v55  ;;  %v5070_v15 = vand.u32 4294901760, %v9164_v9  ;;  %v5050_v12 = vpop.f32.mrb[23].mxu1 }
 0x706   :  { %v5172_v49 = vand.u32 4294901760, %v5171_v27  ;;  %v5067_v31 = vand.u32 4294901760, %v5050_v12  ;;  %10474 = vmatprep.subr.bf16.mxu0 %v12306_v63  ;;  %v10489_v39 = vpack.c.bf16 %v5178_v55, %v5171_v27 }
 0x707   :  { %v5180_v25 = vsub.f32 %v5178_v55, %v5179_v32  ;;  %v5192_v16 = vsub.f32 %v9164_v9, %v5070_v15  ;;  %10476 = vmatpush3.bf16.msra.mxu0 %v12306_v63 }
 0x708   :  { %v5173_v45 = vsub.f32 %v5171_v27, %v5172_v49  ;;  %v10477_v29 = vpack.c.bf16 %v5070_v15, %v5067_v31  ;;  %v5185_v6 = vsub.f32 %v5050_v12, %v5067_v31  ;;  %v10505_v36 = vpack.c.bf16 %v5179_v32, %v5172_v49  ;;  %v10981_v27 = vld [vmem:[#allocation5 + $0x8] sm:$0xff]  ;;  %v10982_v15 = vld [vmem:[#allocation5 + $0x10] sm:$0xff] }
 0x709   :  { %v5193_v48 = vand.u32 4294901760, %v5192_v16  ;;  %v5181_v59 = vand.u32 4294901760, %v5180_v25  ;;  %v12766_v32 = vld [vmem:[#allocation36_spill] sm:$0xff] }
 0x70a   :  { %v5186_v58 = vand.u32 4294901760, %v5185_v6  ;;  %10478 = vmatprep.subr.bf16.mxu0 %v10477_v29  ;;  %v5174_v11 = vand.u32 4294901760, %v5173_v45  ;;  %v10493_v4 = vpack.c.bf16 %v5192_v16, %v5185_v6 }
 0x70b   :  { %v5194_v34 = vsub.f32 %v5192_v16, %v5193_v48  ;;  %10480 = vmatpush3.bf16.msra.mxu0 %v10477_v29  ;;  %v5680_v16 = vmul.f32 %v10982_v15, %v12766_v32 }
 0x70c   :  { %v5187_v23 = vsub.f32 %v5185_v6, %v5186_v58  ;;  %v10481_v42 = vpack.c.bf16 %v5181_v59, %v5174_v11  ;;  %v10509_v20 = vpack.c.bf16 %v5193_v48, %v5186_v58  ;;  %v12767_v6 = vld [vmem:[#allocation37_spill] sm:$0xff] }
 0x70d   :  { %v5195_v19 = vand.u32 4294901760, %v5194_v34  ;;  %v12360_v45 = vand.u32 4294901760, %v5680_v16 }
 0x70e   :  { %9174 = vmatmul.mubr.f32.vlgmr.msra.gmra.mrb[12].mxu0 %v11616_v10  ;;  %10482 = vmatprep.subr.bf16.mxu0 %v10481_v42  ;;  %v5188_v9 = vand.u32 4294901760, %v5187_v23 }
 0x70f   :  { %10484 = vmatpush3.bf16.msra.mxu0 %v10481_v42  ;;  %9176 = vmatprep.mubr.f32.mxu0 %v11622_v7  ;;  %v12764_v42 = vld [vmem:[#allocation34_spill] sm:$0xff]  ;;  %v12370_v48 = vsub.f32 %v5680_v16, %v12360_v45 }
 0x710   :  { %v10485_v31 = vpack.c.bf16 %v5195_v19, %v5188_v9  ;;  %v10980_v19 = vld [vmem:[#allocation5] sm:$0xff] }
 0x711   :  { %v5678_v23 = vmul.f32 %v10980_v19, %v12764_v42  ;;  %v5785_v9 = vand.u32 4294901760, %v12370_v48  ;;  %v12787_v16 = vld [vmem:[#allocation42_spill] sm:$0xff] }
 0x712   :  { %9177 = vmatmul.mubr.f32.gmra.mrb[14].mxu0 %v11625_v57  ;;  %10486 = vmatprep.subr.bf16.mxu0 %v10485_v31 }
 0x713   :  { %10488 = vmatpush3.bf16.msra.mxu0 %v10485_v31  ;;  %9187 = vmatprep.mubr.f32.mxu0 %v11565_v52  ;;  %v12327_v34 = vand.u32 4294901760, %v5678_v23  ;;  %v5786_v42 = vsub.f32 %v12370_v48, %v5785_v9 }
 0x714   :  { %10490 = vmatprep.subr.bf16.mxu0 %v10489_v39 }
 0x716   :  { %9188 = vmatmul.mubr.f32.vlgmr.msra.gmra.mrb[12].mxu0 %v11581_v46 }
 0x717   :  { %10492 = vmatpush3.bf16.msra.mxu0 %v10489_v39  ;;  %9190 = vmatprep.mubr.f32.mxu0 %v11583_v50  ;;  %v10983_v39 = vld [vmem:[#allocation5 + $0x18] sm:$0xff] }
 0x718   :  { %10494 = vmatprep.subr.bf16.mxu0 %v10493_v4 }
 0x71a   :  { %9191 = vmatmul.mubr.f32.gmra.mrb[14].mxu0 %v11589_v44 }
 0x71b   :  { %10496 = vmatpush3.bf16.msra.mxu0 %v10493_v4  ;;  %9201 = vmatprep.mubr.f32.mxu0 %v11568_v2  ;;  %v12332_v4 = vsub.f32 %v5678_v23, %v12327_v34 }
 0x71c   :  { %10498 = vmatprep.subr.bf16.mxu0 %v12306_v63 }
 0x71d   :  { %v5765_v59 = vand.u32 4294901760, %v12332_v4 }
 0x71e   :  { %9202 = vmatmul.mubr.f32.vlgmr.msra.gmra.mrb[12].mxu0 %v11587_v54 }
 0x71f   :  { %10500 = vmatpush3.bf16.msra.mxu0 %v12306_v63  ;;  %9204 = vmatprep.mubr.f32.mxu0 %v11592_v17 }
 0x720   :  { %10502 = vmatprep.subr.bf16.mxu0 %v10477_v29 }
 0x722   :  { %9205 = vmatmul.mubr.f32.gmra.mrb[14].mxu0 %v11598_v41 }
 0x723   :  { %10504 = vmatpush3.bf16.msra.mxu0 %v10477_v29  ;;  %9215 = vmatprep.mubr.f32.mxu0 %v11572_v3 }
 0x724   :  { %10506 = vmatprep.subr.bf16.mxu0 %v10505_v36 }
 0x726   :  { %9216 = vmatmul.mubr.f32.vlgmr.msra.gmra.mrb[12].mxu0 %v11595_v22 }
 0x727   :  { %10508 = vmatpush3.bf16.msra.mxu0 %v10505_v36  ;;  %9218 = vmatprep.mubr.f32.mxu0 %v11601_v61 }
 0x728   :  { %10510 = vmatprep.subr.bf16.mxu0 %v10509_v20 }
 0x72a   :  { %9219 = vmatmul.mubr.f32.gmra.mrb[14].mxu0 %v11609_v35 }
 0x72b   :  { %10512 = vmatpush3.bf16.msra.mxu0 %v10509_v20  ;;  %9229 = vmatprep.mubr.f32.mxu0 %v11565_v52  ;;  %v5766_v20 = vsub.f32 %v12332_v4, %v5765_v59 }
 0x72c   :  { %10514 = vmatprep.subr.bf16.mxu0 %v12306_v63 }
 0x72d   :  { %v5767_v49 = vand.u32 4294901760, %v5766_v20 }
 0x72e   :  { %9230 = vmatmul.mubr.f32.vlgmr.msra.gmra.mrb[12].mxu0 %v11581_v46 }
 0x72f   :  { %10516 = vmatpush3.bf16.msra.mxu0 %v12306_v63  ;;  %9232 = vmatprep.mubr.f32.mxu0 %v11583_v50  ;;  %v12765_v63 = vld [vmem:[#allocation35_spill] sm:$0xff] }
 0x730   :  { %10518 = vmatprep.subr.bf16.mxu0 %v10477_v29  ;;  %v5679_v12 = vmul.f32 %v10981_v27, %v12765_v63 }
 0x732   :  { %9233 = vmatmul.mubr.f32.gmra.mrb[14].mxu0 %v11589_v44  ;;  %v12356_v25 = vand.u32 4294901760, %v5679_v12 }
 0x733   :  { %10520 = vmatpush3.bf16.msra.mxu0 %v10477_v29  ;;  %9243 = vmatprep.mubr.f32.mxu0 %v11565_v52  ;;  %v5681_v29 = vmul.f32 %v10983_v39, %v12767_v6  ;;  %v12788_v6 = vld [vmem:[#allocation45_spill] sm:$0xff] }
 0x734   :  { %10522 = vmatprep.subr.bf16.mxu0 %v11208_v14  ;;  %v12364_v55 = vsub.f32 %v5679_v12, %v12356_v25  ;;  %v12786_v12 = vld [vmem:[#allocation43_spill] sm:$0xff] }
 0x735   :  { %v12366_v36 = vand.u32 4294901760, %v5681_v29 }
 0x736   :  { %9244 = vmatmul.mubr.f32.vlgmr.msra.gmra.mrb[12].mxu0 %v11581_v46  ;;  %v5775_v58 = vand.u32 4294901760, %v12364_v55 }
 0x737   :  { %10524 = vmatpush3.bf16.msra.mxu0 %v11208_v14  ;;  %9246 = vmatprep.mubr.f32.mxu0 %v11583_v50  ;;  %v12375_v11 = vsub.f32 %v5681_v29, %v12366_v36 }
 0x738   :  { %10526 = vmatprep.subr.bf16.mxu0 %v11216_v18  ;;  %v5776_v31 = vsub.f32 %v12364_v55, %v5775_v58 }
 0x739   :  { %v5795_v19 = vand.u32 4294901760, %v12375_v11 }
 0x73a   :  { %9247 = vmatmul.mubr.f32.gmra.mrb[14].mxu0 %v11589_v44  ;;  %v5777_v23 = vand.u32 4294901760, %v5776_v31  ;;  %v12793_v31 = vld [vmem:[#allocation33_spill] sm:$0xff] }
 0x73b   :  { %10528 = vmatpush3.bf16.msra.mxu0 %v11216_v18  ;;  %9281 = vmatprep.mubr.f32.mxu0 %v5767_v49  ;;  %v5796_v20 = vsub.f32 %v12375_v11, %v5795_v19  ;;  %v5787_v49 = vand.u32 4294901760, %v5786_v42 }
 0x73c   :  { %10530 = vmatprep.subr.bf16.mxu0 %v11235_v28 }
 0x73d   :  { %v5797_v27 = vand.u32 4294901760, %v5796_v20 }
 0x73f   :  { %10532 = vmatpush3.bf16.msra.mxu0 %v11235_v28 }
 0x740   :  { %10534 = vmatprep.subr.bf16.mxu0 %v11249_v37 }
 0x743   :  { %10536 = vmatpush3.bf16.msra.mxu0 %v11249_v37 }
 0x744   :  { %10538 = vmatprep.subr.bf16.mxu0 %v11268_v47 }
 0x747   :  { %10540 = vmatpush3.bf16.msra.mxu0 %v11268_v47 }
 0x748   :  { %10542 = vmatprep.subr.bf16.mxu0 %v11289_v60 }
 0x74b   :  { %10544 = vmatpush3.bf16.msra.mxu0 %v11289_v60 }
 0x74c   :  { %10546 = vmatprep.subr.bf16.mxu0 %v11312_v8 }
 0x74f   :  { %10548 = vmatpush3.bf16.msra.mxu0 %v11312_v8 }
 0x750   :  { %10550 = vmatprep.subr.bf16.mxu0 %v11329_v24 }
 0x753   :  { %10552 = vmatpush3.bf16.msra.mxu0 %v11329_v24 }
 0x754   :  { %10554 = vmatprep.subr.bf16.mxu0 %v11364_v56 }
 0x756   :  { %9282 = vmatmul.mubr.f32.vlgmr.msra.gmra.mrb[16].mxu0 %v5777_v23  ;;  %v12795_v23 = vld [vmem:[#allocation47_spill] sm:$0xff] }
 0x757   :  { %10556 = vmatpush3.bf16.msra.mxu0 %v11364_v56  ;;  %9284 = vmatprep.mubr.f32.mxu0 %v5787_v49  ;;  %v12775_v56 = vld [vmem:[#allocation23_spill] sm:$0xff]  ;;  %v7097_v20 = vadd.f32 0.0001, %v12795_v23 }
 0x758   :  { %10558 = vmatprep.subr.bf16.mxu0 %v11390_v43 }
 0x75a   :  { %9285 = vmatmul.mubr.f32.gmra.mrb[18].mxu0 %v5797_v27  ;;  %v12796_v27 = vld [vmem:[#allocation48_spill] sm:$0xff] }
 0x75b   :  { %10560 = vmatpush3.bf16.msra.mxu0 %v11390_v43  ;;  %9319 = vmatprep.mubr.f32.mxu0 %v12327_v34  ;;  %v12774_v43 = vld [vmem:[#allocation22_spill] sm:$0xff] }
 0x75c   :  { %10562 = vmatprep.subr.bf16.mxu0 %v11407_v0 }
 0x75f   :  { %10564 = vmatpush3.bf16.msra.mxu0 %v11407_v0  ;;  %v12776_v0 = vld [vmem:[#allocation24_spill] sm:$0xff] }
 0x760   :  { %10566 = vmatprep.subr.bf16.mxu0 %v11421_v53 }
 0x763   :  { %10568 = vmatpush3.bf16.msra.mxu0 %v11421_v53  ;;  %v12780_v53 = vld [vmem:[#allocation15_spill] sm:$0xff] }
 0x764   :  { %10570 = vmatprep.subr.bf16.mxu0 %v11432_v5 }
 0x767   :  { %10572 = vmatpush3.bf16.msra.mxu0 %v11432_v5 }
 0x768   :  { %10574 = vmatprep.subr.bf16.mxu0 %v11447_v38 }
 0x76b   :  { %10576 = vmatpush3.bf16.msra.mxu0 %v11447_v38  ;;  %v12782_v38 = vld [vmem:[#allocation27_spill] sm:$0xff] }
 0x76c   :  { %10578 = vmatprep.subr.bf16.mxu0 %v11455_v33 }
 0x76f   :  { %10580 = vmatpush3.bf16.msra.mxu0 %v11455_v33  ;;  %v12779_v33 = vld [vmem:[#allocation26_spill] sm:$0xff] }
 0x770   :  { %10582 = vmatprep.subr.bf16.mxu0 %v11461_v13  ;;  %v12781_v5 = vsub.f32 %v12779_v33, %v12780_v53 }
 0x773   :  { %10584 = vmatpush3.bf16.msra.mxu0 %v11461_v13  ;;  %v12783_v13 = vld [vmem:[#allocation31_spill] sm:$0xff] }
 0x774   :  { %10586 = vmatprep.subr.bf16.mxu0 %v11224_v21 }
 0x776   :  { %9320 = vmatmul.mubr.f32.vlgmr.msra.gmra.mrb[16].mxu0 %v12356_v25 }
 0x777   :  { %10588 = vmatpush3.bf16.msra.mxu0 %v11224_v21  ;;  %9322 = vmatprep.mubr.f32.mxu0 %v12360_v45  ;;  %v12768_v21 = vld [vmem:[#allocation16_spill] sm:$0xff] }
 0x778   :  { %10590 = vmatprep.subr.bf16.mxu0 %v11231_v26 }
 0x77a   :  { %9323 = vmatmul.mubr.f32.gmra.mrb[18].mxu0 %v12366_v36 }
 0x77b   :  { %10592 = vmatpush3.bf16.msra.mxu0 %v11231_v26  ;;  %9357 = vmatprep.mubr.f32.mxu0 %v12332_v4  ;;  %v12769_v26 = vld [vmem:[#allocation17_spill] sm:$0xff] }
 0x77c   :  { %10594 = vmatprep.subr.bf16.mxu0 %v11242_v30  ;;  %v12785_v4 = vld [vmem:[#allocation41_spill] sm:$0xff] }
 0x77f   :  { %10596 = vmatpush3.bf16.msra.mxu0 %v11242_v30  ;;  %v12770_v30 = vld [vmem:[#allocation18_spill] sm:$0xff] }
 0x780   :  { %10598 = vmatprep.subr.bf16.mxu0 %v11258_v40 }
 0x783   :  { %10600 = vmatpush3.bf16.msra.mxu0 %v11258_v40  ;;  %v12771_v40 = vld [vmem:[#allocation19_spill] sm:$0xff] }
 0x784   :  { %10602 = vmatprep.subr.bf16.mxu0 %v11279_v51 }
 0x787   :  { %10604 = vmatpush3.bf16.msra.mxu0 %v11279_v51  ;;  %v12772_v51 = vld [vmem:[#allocation20_spill] sm:$0xff] }
 0x788   :  { %10606 = vmatprep.subr.bf16.mxu0 %v11298_v1 }
 0x78b   :  { %10608 = vmatpush3.bf16.msra.mxu0 %v11298_v1  ;;  %v12773_v1 = vld [vmem:[#allocation21_spill] sm:$0xff] }
 0x78c   :  { %10610 = vmatprep.subr.bf16.mxu0 %v12712_v62 }
 0x78f   :  { %10612 = vmatpush3.bf16.msra.mxu0 %v12712_v62  ;;  %v12784_v62 = vsub.f32 %v12782_v38, %v12783_v13 }
 0x790   :  { %10614 = vmatprep.subr.bf16.mxu0 %v12768_v21 }
 0x793   :  { %10616 = vmatpush3.bf16.msra.mxu0 %v12768_v21  ;;  %v7096_v21 = vadd.f32 0.0001, %v12796_v27 }
 0x794   :  { %10618 = vmatprep.subr.bf16.mxu0 %v11208_v14 }
 0x796   :  { %9358 = vmatmul.mubr.f32.vlgmr.msra.gmra.mrb[16].mxu0 %v12364_v55  ;;  %v12789_v55 = vld [vmem:[#allocation28_spill] sm:$0xff] }
 0x797   :  { %10620 = vmatpush3.bf16.msra.mxu0 %v11208_v14  ;;  %9360 = vmatprep.mubr.f32.mxu0 %v12370_v48 }
 0x798   :  { %10622 = vmatprep.subr.bf16.mxu0 %v11216_v18 }
 0x79a   :  { %9361 = vmatmul.mubr.f32.gmra.mrb[18].mxu0 %v12375_v11 }
 0x79b   :  { %10624 = vmatpush3.bf16.msra.mxu0 %v11216_v18  ;;  %9395 = vmatprep.mubr.f32.mxu0 %v5765_v59  ;;  %v7095_v59 = vadd.f32 0.0001, %v12785_v4 }
 0x79c   :  { %10626 = vmatprep.subr.bf16.mxu0 %v11235_v28 }
 0x79f   :  { %10628 = vmatpush3.bf16.msra.mxu0 %v11235_v28 }
 0x7a0   :  { %10630 = vmatprep.subr.bf16.mxu0 %v11249_v37 }
 0x7a3   :  { %10632 = vmatpush3.bf16.msra.mxu0 %v11249_v37 }
 0x7a4   :  { %10634 = vmatprep.subr.bf16.mxu0 %v11268_v47 }
 0x7a7   :  { %10636 = vmatpush3.bf16.msra.mxu0 %v11268_v47 }
 0x7a8   :  { %10638 = vmatprep.subr.bf16.mxu0 %v11289_v60 }
 0x7ab   :  { %10640 = vmatpush3.bf16.msra.mxu0 %v11289_v60 }
 0x7ac   :  { %10642 = vmatprep.subr.bf16.mxu0 %v11312_v8 }
 0x7af   :  { %10644 = vmatpush3.bf16.msra.mxu0 %v11312_v8 }
 0x7b0   :  { %10646 = vmatprep.subr.bf16.mxu0 %v11329_v24 }
 0x7b3   :  { %10648 = vmatpush3.bf16.msra.mxu0 %v11329_v24 }
 0x7b4   :  { %10650 = vmatprep.subr.bf16.mxu0 %v12769_v26 }
 0x7b6   :  { %9396 = vmatmul.mubr.f32.vlgmr.msra.gmra.mrb[16].mxu0 %v5775_v58 }
 0x7b7   :  { %10652 = vmatpush3.bf16.msra.mxu0 %v12769_v26  ;;  %9398 = vmatprep.mubr.f32.mxu0 %v5785_v9  ;;  %v12792_v9 = vld [vmem:[#allocation29_spill] sm:$0xff] }
 0x7b8   :  { %10654 = vmatprep.subr.bf16.mxu0 %v12770_v30 }
 0x7ba   :  { %9399 = vmatmul.mubr.f32.gmra.mrb[18].mxu0 %v5795_v19  ;;  %v12794_v19 = vsub.f32 %v12792_v9, %v12793_v31 }
 0x7bb   :  { %10656 = vmatpush3.bf16.msra.mxu0 %v12770_v30  ;;  %9433 = vmatprep.mubr.f32.mxu0 %v12327_v34 }
 0x7bc   :  { %10658 = vmatprep.subr.bf16.mxu0 %v12771_v40 }
 0x7bf   :  { %10660 = vmatpush3.bf16.msra.mxu0 %v12771_v40 }
 0x7c0   :  { %10662 = vmatprep.subr.bf16.mxu0 %v12772_v51 }
 0x7c3   :  { %10664 = vmatpush3.bf16.msra.mxu0 %v12772_v51 }
 0x7c4   :  { %10666 = vmatprep.subr.bf16.mxu0 %v12773_v1 }
 0x7c7   :  { %10668 = vmatpush3.bf16.msra.mxu0 %v12773_v1 }
 0x7c8   :  { %10670 = vmatprep.subr.bf16.mxu0 %v12774_v43 }
 0x7cb   :  { %10672 = vmatpush3.bf16.msra.mxu0 %v12774_v43 }
 0x7cc   :  { %10674 = vmatprep.subr.bf16.mxu0 %v12775_v56 }
 0x7cf   :  { %10676 = vmatpush3.bf16.msra.mxu0 %v12775_v56 }
 0x7d0   :  { %10678 = vmatprep.subr.bf16.mxu0 %v12776_v0 }
 0x7d3   :  { %10680 = vmatpush3.bf16.msra.mxu0 %v12776_v0 }
 0x7d4   :  { %10682 = vmatprep.subr.bf16.mxu0 %v11208_v14 }
 0x7d6   :  { %9434 = vmatmul.mubr.f32.vlgmr.msra.gmra.mrb[16].mxu0 %v12356_v25 }
 0x7d7   :  { %10684 = vmatpush3.bf16.msra.mxu0 %v11208_v14  ;;  %9436 = vmatprep.mubr.f32.mxu0 %v12360_v45 }
 0x7d8   :  { %10686 = vmatprep.subr.bf16.mxu0 %v11216_v18 }
 0x7da   :  { %9437 = vmatmul.mubr.f32.gmra.mrb[18].mxu0 %v12366_v36 }
 0x7db   :  { %10688 = vmatpush3.bf16.msra.mxu0 %v11216_v18  ;;  %9471 = vmatprep.mubr.f32.mxu0 %v12327_v34  ;;  %v12777_v18 = vld [vmem:[#allocation30_spill] sm:$0xff] }
 0x7dc   :  { %10690 = vmatprep.subr.bf16.mxu0 %v11235_v28 }
 0x7df   :  { %10692 = vmatpush3.bf16.msra.mxu0 %v11235_v28 }
 0x7e0   :  { %10694 = vmatprep.subr.bf16.mxu0 %v11249_v37 }
 0x7e3   :  { %10696 = vmatpush3.bf16.msra.mxu0 %v11249_v37 }
 0x7e4   :  { %10698 = vmatprep.subr.bf16.mxu0 %v11268_v47 }
 0x7e7   :  { %10700 = vmatpush3.bf16.msra.mxu0 %v11268_v47  ;;  %v12778_v47 = vld [vmem:[#allocation39_spill] sm:$0xff] }
 0x7e8   :  { %10702 = vmatprep.subr.bf16.mxu0 %v11289_v60 }
 0x7eb   :  { %10704 = vmatpush3.bf16.msra.mxu0 %v11289_v60 }
 0x7ec   :  { %10706 = vmatprep.subr.bf16.mxu0 %v11312_v8 }
 0x7ef   :  { %10708 = vmatpush3.bf16.msra.mxu0 %v11312_v8 }
 0x7f0   :  { %10710 = vmatprep.subr.bf16.mxu0 %v11329_v24 }
 0x7f3   :  { %10712 = vmatpush3.bf16.msra.mxu0 %v11329_v24 }
 0x7f6   :  { %9472 = vmatmul.mubr.f32.vlgmr.msra.gmra.mrb[16].mxu0 %v12356_v25  ;;  %v7094_v25 = vadd.f32 0.0001, %v12787_v16 }
 0x7f7   :  { %9474 = vmatprep.mubr.f32.mxu0 %v12360_v45 }
 0x7fa   :  { %9475 = vmatmul.mubr.f32.gmra.mrb[18].mxu0 %v12366_v36  ;;  %v12790_v36 = vld [vmem:[#allocation32_spill] sm:$0xff] }
 0x7fb   :  { %v12791_v48 = vsub.f32 %v12789_v55, %v12790_v36 }
 0x809   :  { %v9245_v14 = vpop.f32.mrb[12].mxu0 }
 0x80a   :  { %v5675_v28 = vsub.f32 %v9245_v14, %v12777_v18  ;;  %v5652_v37 = vpop.f32.mrb[13].mxu0 }
 0x80b   :  { %v5674_v60 = vsub.f32 %v5652_v37, %v12778_v47 }
 0x80c   :  { %v7099_v8 = vadd.f32 %v5675_v28, %v12781_v5 }
 0x80d   :  { %v7098_v24 = vadd.f32 %v5674_v60, %v12784_v62  ;;  %v9248_v34 = vpop.f32.mrb[14].mxu0 }
 0x80e   :  { %v7103_v63 = vadd.f32 0.0009, %v7099_v8  ;;  %v5677_v15 = vsub.f32 %v9248_v34, %v12786_v12  ;;  %v5664_v32 = vpop.f32.mrb[15].mxu0 }
 0x80f   :  { %v7102_v39 = vadd.f32 0.0009, %v7098_v24  ;;  %v5676_v29 = vsub.f32 %v5664_v32, %v12788_v6 }
 0x810   :  { %v12509_v45 = vmul.f32 %v7103_v63, %v7095_v59  ;;  %v7101_v58 = vadd.f32 %v5677_v15, %v12791_v48 }
 0x811   :  { %v12514_v11 = vmul.f32 %v7102_v39, %v7094_v25  ;;  %v7100_v42 = vadd.f32 %v5676_v29, %v12794_v19 }
 0x812   :  { %v7105_v49 = vadd.f32 0.0009, %v7101_v58  ;;  %10968 = vrcp.f32 %v12509_v45 }
 0x813   :  { %v7104_v26 = vadd.f32 0.0009, %v7100_v42  ;;  %10970 = vrcp.f32 %v12514_v11  ;;  %v12800_v11 = vld [vmem:[#allocation46_spill] sm:$0xff] }
 0x814   :  { %v12521_v30 = vmul.f32 %v7105_v49, %v7097_v20  ;;  %v7072_v31 = vmul.f32 2.0, %v12800_v11 }
 0x815   :  { %v12523_v40 = vmul.f32 %v7104_v26, %v7096_v21 }
 0x816   :  { %10972 = vrcp.f32 %v12521_v30 }
 0x817   :  { %10974 = vrcp.f32 %v12523_v40 }
 0x81c   :  { %v10969_v23 = vpop.eup %10968 }
 0x81d   :  { %v10971_v27 = vpop.eup %10970 }
 0x8c9   :  { %v9473_v51 = vpop.f32.mrb[16].mxu0 }
 0x8ca   :  { %v6456_v1 = vand.u32 4294901760, %v9473_v51  ;;  %v6430_v43 = vpop.f32.mrb[17].mxu0 }
 0x8cb   :  { %v6453_v56 = vand.u32 4294901760, %v6430_v43 }
 0x8cc   :  { %v6570_v0 = vsub.f32 %v9473_v51, %v6456_v1  ;;  %v7076_v51 = vadd.f32 0.0001, %v7072_v31 }
 0x8cd   :  { %v12525_v14 = vpack.c.bf16 %v6456_v1, %v6453_v56  ;;  %v6563_v18 = vsub.f32 %v6430_v43, %v6453_v56  ;;  %v9476_v28 = vpop.f32.mrb[18].mxu0 }
 0x8ce   :  { %v6571_v37 = vand.u32 4294901760, %v6570_v0  ;;  %v6462_v47 = vand.u32 4294901760, %v9476_v28  ;;  %v6442_v60 = vpop.f32.mrb[19].mxu0 }
 0x8cf   :  { %v6564_v33 = vand.u32 4294901760, %v6563_v18  ;;  %v6459_v53 = vand.u32 4294901760, %v6442_v60  ;;  %10714 = vmatprep.subr.bf16.mxu1 %v12525_v14  ;;  %v10729_v5 = vpack.c.bf16 %v6570_v0, %v6563_v18 }
 0x8d0   :  { %v6572_v8 = vsub.f32 %v6570_v0, %v6571_v37  ;;  %v6584_v38 = vsub.f32 %v9476_v28, %v6462_v47  ;;  %10716 = vmatpush3.bf16.msra.mxu1 %v12525_v14  ;;  %v10973_v0 = vpop.eup %10972 }
 0x8d1   :  { %v6565_v13 = vsub.f32 %v6563_v18, %v6564_v33  ;;  %v10717_v62 = vpack.c.bf16 %v6462_v47, %v6459_v53  ;;  %v6577_v24 = vsub.f32 %v6442_v60, %v6459_v53  ;;  %v10745_v34 = vpack.c.bf16 %v6571_v37, %v6564_v33  ;;  %v10975_v28 = vpop.eup %10974 }
 0x8d2   :  { %v6585_v4 = vand.u32 4294901760, %v6584_v38  ;;  %v6573_v59 = vand.u32 4294901760, %v6572_v8 }
 0x8d3   :  { %v6578_v63 = vand.u32 4294901760, %v6577_v24  ;;  %10718 = vmatprep.subr.bf16.mxu1 %v10717_v62  ;;  %v6566_v12 = vand.u32 4294901760, %v6565_v13  ;;  %v10733_v15 = vpack.c.bf16 %v6584_v38, %v6577_v24 }
 0x8d4   :  { %v6586_v32 = vsub.f32 %v6584_v38, %v6585_v4  ;;  %10720 = vmatpush3.bf16.msra.mxu1 %v10717_v62 }
 0x8d5   :  { %v6579_v16 = vsub.f32 %v6577_v24, %v6578_v63  ;;  %v10721_v25 = vpack.c.bf16 %v6573_v59, %v6566_v12  ;;  %v10749_v39 = vpack.c.bf16 %v6585_v4, %v6578_v63 }
 0x8d6   :  { %v6587_v6 = vand.u32 4294901760, %v6586_v32 }
 0x8d7   :  { %v6580_v29 = vand.u32 4294901760, %v6579_v16  ;;  %9486 = vmatmul.mubr.f32.vlgmr.msra.gmra.mrb[24].mxu1 %v11616_v10  ;;  %10722 = vmatprep.subr.bf16.mxu1 %v10721_v25 }
 0x8d8   :  { %10724 = vmatpush3.bf16.msra.mxu1 %v10721_v25  ;;  %9488 = vmatprep.mubr.f32.mxu1 %v11622_v7 }
 0x8d9   :  { %v10725_v55 = vpack.c.bf16 %v6587_v6, %v6580_v29 }
 0x8db   :  { %9489 = vmatmul.mubr.f32.gmra.mrb[26].mxu1 %v11625_v57  ;;  %10726 = vmatprep.subr.bf16.mxu1 %v10725_v55 }
 0x8dc   :  { %10728 = vmatpush3.bf16.msra.mxu1 %v10725_v55  ;;  %9499 = vmatprep.mubr.f32.mxu1 %v11565_v52 }
 0x8dd   :  { %10730 = vmatprep.subr.bf16.mxu1 %v10729_v5 }
 0x8df   :  { %9500 = vmatmul.mubr.f32.vlgmr.msra.gmra.mrb[24].mxu1 %v11581_v46 }
 0x8e0   :  { %10732 = vmatpush3.bf16.msra.mxu1 %v10729_v5  ;;  %9502 = vmatprep.mubr.f32.mxu1 %v11583_v50 }
 0x8e1   :  { %10734 = vmatprep.subr.bf16.mxu1 %v10733_v15 }
 0x8e3   :  { %9503 = vmatmul.mubr.f32.gmra.mrb[26].mxu1 %v11589_v44 }
 0x8e4   :  { %10736 = vmatpush3.bf16.msra.mxu1 %v10733_v15  ;;  %9513 = vmatprep.mubr.f32.mxu1 %v11568_v2  ;;  %v12797_v2 = vld [vmem:[#allocation38_spill] sm:$0xff] }
 0x8e5   :  { %10738 = vmatprep.subr.bf16.mxu1 %v12525_v14  ;;  %v7071_v10 = vmul.f32 2.0, %v12797_v2 }
 0x8e7   :  { %9514 = vmatmul.mubr.f32.vlgmr.msra.gmra.mrb[24].mxu1 %v11587_v54 }
 0x8e8   :  { %10740 = vmatpush3.bf16.msra.mxu1 %v12525_v14  ;;  %9516 = vmatprep.mubr.f32.mxu1 %v11592_v17  ;;  %v12798_v17 = vld [vmem:[#allocation40_spill] sm:$0xff] }
 0x8e9   :  { %10742 = vmatprep.subr.bf16.mxu1 %v10717_v62 }
 0x8eb   :  { %9517 = vmatmul.mubr.f32.gmra.mrb[26].mxu1 %v11598_v41  ;;  %v7075_v41 = vadd.f32 0.0001, %v7071_v10 }
 0x8ec   :  { %10744 = vmatpush3.bf16.msra.mxu1 %v10717_v62  ;;  %9527 = vmatprep.mubr.f32.mxu1 %v11572_v3 }
 0x8ed   :  { %10746 = vmatprep.subr.bf16.mxu1 %v10745_v34 }
 0x8ef   :  { %9528 = vmatmul.mubr.f32.vlgmr.msra.gmra.mrb[24].mxu1 %v11595_v22 }
 0x8f0   :  { %10748 = vmatpush3.bf16.msra.mxu1 %v10745_v34  ;;  %9530 = vmatprep.mubr.f32.mxu1 %v11601_v61 }
 0x8f1   :  { %10750 = vmatprep.subr.bf16.mxu1 %v10749_v39 }
 0x8f3   :  { %9531 = vmatmul.mubr.f32.gmra.mrb[26].mxu1 %v11609_v35  ;;  %v12799_v35 = vld [vmem:[#allocation44_spill] sm:$0xff] }
 0x8f4   :  { %10752 = vmatpush3.bf16.msra.mxu1 %v10749_v39  ;;  %9541 = vmatprep.mubr.f32.mxu1 %v11565_v52  ;;  %v7073_v45 = vmul.f32 2.0, %v12799_v35 }
 0x8f5   :  { %10754 = vmatprep.subr.bf16.mxu1 %v12525_v14 }
 0x8f6   :  { %v7077_v26 = vadd.f32 0.0001, %v7073_v45 }
 0x8f7   :  { %9542 = vmatmul.mubr.f32.vlgmr.msra.gmra.mrb[24].mxu1 %v11581_v46 }
 0x8f8   :  { %10756 = vmatpush3.bf16.msra.mxu1 %v12525_v14  ;;  %9544 = vmatprep.mubr.f32.mxu1 %v11583_v50 }
 0x8f9   :  { %10758 = vmatprep.subr.bf16.mxu1 %v10717_v62 }
 0x8fb   :  { %9545 = vmatmul.mubr.f32.gmra.mrb[26].mxu1 %v11589_v44 }
 0x8fc   :  { %10760 = vmatpush3.bf16.msra.mxu1 %v10717_v62  ;;  %9555 = vmatprep.mubr.f32.mxu1 %v11565_v52 }
 0x8ff   :  { %9556 = vmatmul.mubr.f32.vlgmr.msra.gmra.mrb[24].mxu1 %v11581_v46  ;;  %v7070_v46 = vmul.f32 2.0, %v12798_v17 }
 0x900   :  { %9558 = vmatprep.mubr.f32.mxu1 %v11583_v50 }
 0x901   :  { %v7074_v48 = vadd.f32 0.0001, %v7070_v46 }
 0x903   :  { %9559 = vmatmul.mubr.f32.gmra.mrb[26].mxu1 %v11589_v44 }
 0x9d2   :  { %v9557_v7 = vpop.f32.mrb[24].mxu1 }
 0x9d3   :  { %v7067_v3 = vsub.f32 %v9557_v7, %v12797_v2  ;;  %v7044_v54 = vpop.f32.mrb[25].mxu1 }
 0x9d4   :  { %v7066_v52 = vsub.f32 %v7044_v54, %v12798_v17 }
 0x9d5   :  { %v7079_v50 = vmul.f32 2.0, %v7067_v3 }
 0x9d6   :  { %v7078_v44 = vmul.f32 2.0, %v7066_v52  ;;  %v9560_v22 = vpop.f32.mrb[26].mxu1 }
 0x9d7   :  { %v7083_v61 = vadd.f32 0.0009, %v7079_v50  ;;  %v7069_v57 = vsub.f32 %v9560_v22, %v12799_v35  ;;  %v7056_v36 = vpop.f32.mrb[27].mxu1 }
 0x9d8   :  { %v7082_v58 = vadd.f32 0.0009, %v7078_v44  ;;  %v7068_v9 = vsub.f32 %v7056_v36, %v12800_v11 }
 0x9d9   :  { %v7087_v19 = vmul.f32 %v7083_v61, %v7075_v41  ;;  %v7081_v42 = vmul.f32 2.0, %v7069_v57 }
 0x9da   :  { %v7086_v20 = vmul.f32 %v7082_v58, %v7074_v48  ;;  %v7080_v49 = vmul.f32 2.0, %v7068_v9 }
 0x9db   :  { %v7113_v21 = vmul.f32 %v10969_v23, %v7087_v19  ;;  %v7085_v30 = vadd.f32 0.0009, %v7081_v42 }
 0x9dc   :  { %v7111_v40 = vmul.f32 %v10971_v27, %v7086_v20  ;;  %v7084_v1 = vadd.f32 0.0009, %v7080_v49 }
 0x9dd   :  { %v7119_v43 = vsub.f32 1.0, %v7113_v21  ;;  %v7089_v56 = vmul.f32 %v7085_v30, %v7077_v26 }
 0x9de   :  { %v7118_v14 = vsub.f32 1.0, %v7111_v40  ;;  %v7088_v18 = vmul.f32 %v7084_v1, %v7076_v51 }
 0x9df   :  { %v7123_v37 = vmul.f32 0.5, %v7119_v43  ;;  %v7117_v47 = vmul.f32 %v10973_v0, %v7089_v56 }
 0x9e0   :  { %v7122_v60 = vmul.f32 0.5, %v7118_v14  ;;  %v7115_v33 = vmul.f32 %v10975_v28, %v7088_v18 }
 0x9e1   :  { %v7127_v53 = vmax.f32 %v7123_v37, 0.0  ;;  %v7121_v5 = vsub.f32 1.0, %v7117_v47 }
 0x9e2   :  { %v7126_v8 = vmax.f32 %v7122_v60, 0.0  ;;  %v7120_v38 = vsub.f32 1.0, %v7115_v33 }
 0x9e3   :  { %v7131_v13 = vmin.f32 %v7127_v53, 1.0  ;;  %v7125_v62 = vmul.f32 0.5, %v7121_v5 }
 0x9e4   :  { %v7130_v24 = vmin.f32 %v7126_v8, 1.0  ;;  %v7124_v34 = vmul.f32 0.5, %v7120_v38 }
 0x9e5   :  { %v7129_v59 = vmax.f32 %v7125_v62, 0.0 }
 0x9e6   :  { %v7134_v4 = vadd.f32 %v7131_v13, %v7130_v24  ;;  %v7128_v63 = vmax.f32 %v7124_v34, 0.0 }
 0x9e7   :  { %v7133_v15 = vmin.f32 %v7129_v59, 1.0 }
 0x9e8   :  { %v7132_v12 = vmin.f32 %v7128_v63, 1.0 }
 0x9ea   :  { %v7135_v32 = vadd.f32 %v7134_v4, %v7132_v12 }
 0x9ec   :  { %v7136_v16 = vadd.f32 %v7135_v32, %v7133_v15 }
 0x9ee   :  { %v7137_v25 = vrot.slane %v7136_v16, 4 }
 0x9f0   :  { %v7138_v39 = vadd.f32 %v7137_v25, %v7136_v16 }
 0x9f2   :  { %v7139_v6 = vrot.slane %v7138_v39, 2 }
 0x9f4   :  { %v7140_v29 = vadd.f32 %v7139_v6, %v7138_v39 }
 0x9f6   :  { %v7141_v55 = vrot.slane %v7140_v29, 1 }
 0x9f8   :  { %v7142_v7 = vadd.f32 %v7141_v55, %v7140_v29 }
 0x9fa   :  { %7143 = vst [vmem:[#allocation10] sm:$0x1] %v7142_v7 }
 0x9fb   :  { %11083 = shalt.err (!%p11080_p8)
}
 0x9fc   :  { %s11084_s14 = scalar_lea.hbm %s12584_s4, 16 }
 0x9fd   :  { %p11085_p9 = scmp.ne.s32.totalorder %s12584_s4, %s11084_s14  ;;  %p11088_p10 = scmp.lt.u32.totalorder %s11084_s14, %s12584_s4 }
 0x9ff   :  { %p11090_p11 = pnand %p11088_p10, %p11085_p9 }
 0xa01   :  { %11093 = shalt.err (!%p11090_p11)
}
 0xa02   :  { %7153 = dma.vmem_to_hbm [thread:$0]  %s7151_s27, 16, %s12584_s4, [#allocation4]  }
 0xa03   :  { %11100 = dma.done.wait [#allocation4], 16  }
 0xa04   :  { %11101 = vsyncadd [#allocation4], 4294967280 }
 0xa05   :  { %7157 = vsyncpa [#allocation3], 1 }
 0xa06   :  { %7158 = vsyncpa [#allocation6], 1 }
 0xa07   :  { %7159 = vsyncpa [#allocation9], 1 }
 0xa08   :  { %7160 = vsyncpa [#allocation4], 1 }

</bundles_post_ra>
